<compile_context>
chip_gen: v6e
topology: v6e:2x2x1
jax: 0.10.0
libtpu: 0.0.40
codegen_flags: <defaults>
</compile_context>

<pallas_src>
import functools

import jax
import jax.numpy as jnp
from jax import lax
from jax.experimental import pallas as pl
from jax.experimental.pallas import tpu as pltpu


# --------------------------------------------------------------------------
# Kernel 1: one decode step (embedding gather -> attention -> combine -> BN
#           -> GRU).  Runs once (grid=(1,)).
# --------------------------------------------------------------------------
def decoder_step_kernel(
    # ---- inputs ----
    ids_ref,      # (B,)  int32   SMEM
    h0_ref,       # (B, H)        VMEM (aliased with hnew output)
    enc_ref,      # (B, Tx, H)    VMEM
    attn_w_ref,   # (2H, Tx)      VMEM
    attn_b_ref,   # (1, Tx)       VMEM
    comb_w_ref,   # (2H, H)       VMEM
    comb_b_ref,   # (1, H)        VMEM
    bn_g_ref,     # (1, H)        VMEM
    bn_b_ref,     # (1, H)        VMEM
    w_ih_ref,     # (3, H, H)     VMEM  gate order [r, z, n]
    w_hh_ref,     # (3, H, H)     VMEM
    b_ih_ref,     # (3, 1, H)     VMEM
    b_hh_ref,     # (3, 1, H)     VMEM
    emb_hbm_ref,  # (V, H)        HBM (pl.ANY) embedding table
    # ---- outputs ----
    hnew_ref,     # (B, H)
    attnw_ref,    # (B, Tx)
    # ---- scratch ----
    emb_vmem,     # (B, H) f32    gathered embedding rows
    emb_sem,      # (B,) DMA semaphores
):
    B, H = h0_ref.shape
    f32 = jnp.float32

    # 1) Issue the embedding row gathers (B is small & static -> unrolled).
    copies = []
    for b in range(B):
        tok = ids_ref[b]
        cp = pltpu.make_async_copy(
            emb_hbm_ref.at[pl.ds(tok, 1), :],
            emb_vmem.at[pl.ds(b, 1), :],
            emb_sem.at[b])
        cp.start()
        copies.append(cp)

    # 2) h0-only MXU work, overlapped with the gather DMAs.
    h0 = h0_ref[...]                                           # (B, H)
    attn_logits_h = jnp.dot(h0, attn_w_ref[H:2 * H, :],
                            preferred_element_type=f32)        # (B, Tx)
    gh_r = jnp.dot(h0, w_hh_ref[0], preferred_element_type=f32) + b_hh_ref[0]
    gh_z = jnp.dot(h0, w_hh_ref[1], preferred_element_type=f32) + b_hh_ref[1]
    gh_n = jnp.dot(h0, w_hh_ref[2], preferred_element_type=f32) + b_hh_ref[2]

    # 3) Wait for the gathers, then the embedded-dependent half.
    for cp in copies:
        cp.wait()
    embedded = emb_vmem[...]                                   # (B, H)
    # dropout -> identity (see header note)

    # attention weights: softmax(attn(cat(embedded, h0))) -- concat-free.
    attn_logits = (jnp.dot(embedded, attn_w_ref[0:H, :],
                           preferred_element_type=f32)
                   + attn_logits_h + attn_b_ref[...])          # (B, Tx)
    am = jnp.max(attn_logits, axis=1, keepdims=True)
    ae = jnp.exp(attn_logits - am)
    attn_w = ae / jnp.sum(ae, axis=1, keepdims=True)           # exact softmax
    attnw_ref[...] = attn_w

    # attn_applied = bmm(attn_w[:, None, :], encoder_outputs)[:, 0, :]
    attn_applied = jnp.einsum(
        "bqt,bth->bqh", attn_w[:, None, :], enc_ref[...],
        preferred_element_type=f32)[:, 0, :]                   # (B, H)

    # attn_combine + ReLU -- concat-free split matmul.
    comb = (jnp.dot(embedded, comb_w_ref[0:H, :], preferred_element_type=f32)
            + jnp.dot(attn_applied, comb_w_ref[H:2 * H, :],
                      preferred_element_type=f32)
            + comb_b_ref[...])
    act = jnp.maximum(comb, 0.0)                               # (B, H)

    # BatchNorm1d (training-mode batch statistics, eps=1e-5, biased var).
    mean = jnp.mean(act, axis=0, keepdims=True)
    var = jnp.mean((act - mean) ** 2, axis=0, keepdims=True)
    bn = bn_g_ref[...] * (act - mean) * lax.rsqrt(var + 1e-5) + bn_b_ref[...]

    # GRU single step, gate-separated matmuls, gate order [r, z, n].
    gi_r = jnp.dot(bn, w_ih_ref[0], preferred_element_type=f32) + b_ih_ref[0]
    gi_z = jnp.dot(bn, w_ih_ref[1], preferred_element_type=f32) + b_ih_ref[1]
    gi_n = jnp.dot(bn, w_ih_ref[2], preferred_element_type=f32) + b_ih_ref[2]
    r = jax.nn.sigmoid(gi_r + gh_r)
    z = jax.nn.sigmoid(gi_z + gh_z)
    n = jnp.tanh(gi_n + r * gh_n)
    hnew_ref[...] = (1.0 - z) * n + z * h0                     # (B, H)


# --------------------------------------------------------------------------
# Kernel 2: V-tiled output projection.  Each grid step handles one vocab tile
# independently (raw logits tile + per-tile LSE partial) -> "parallel" grid.
# --------------------------------------------------------------------------
def out_proj_kernel(h_ref, out_w_ref, out_b_ref, logits_ref, lse_ref):
    # h_ref: (B, H) bf16 | out_w_ref: (H, tv) bf16 | out_b_ref: (1, tv) f32
    logits = (jnp.dot(h_ref[...], out_w_ref[...],
                      preferred_element_type=jnp.float32)
              + out_b_ref[...])                                # (B, tv) f32
    logits_ref[...] = logits
    m = jnp.max(logits, axis=1, keepdims=True)                 # (B, 1)
    l = jnp.sum(jnp.exp(logits - m), axis=1, keepdims=True)    # (B, 1)
    lse_ref[0] = m + jnp.log(l)                                # per-tile LSE


# --------------------------------------------------------------------------
# Wrapper
# --------------------------------------------------------------------------
def _round_up(x, m):
    return ((x + m - 1) // m) * m


def _pick_v_tile(V, max_tile=2048):
    # Always lane-aligned; V is padded up to a multiple of the tile.
    if V <= max_tile:
        return _round_up(V, 128)
    return max_tile


def _vmem_limit(block_bytes, headroom=4 * 1024 * 1024, cap=48 * 1024 * 1024):
    # Double-buffered block budget + headroom, capped below v7x's 64 MiB VMEM.
    return int(min(max(2 * block_bytes + headroom, 8 * 1024 * 1024), cap))


def attn_decoder_forward(input_ids, hidden, encoder_outputs, params):
    """input_ids: (B,) int32; hidden: (1,B,H) f32; encoder_outputs: (B,Tx,H) f32."""
    B = input_ids.shape[0]
    H = hidden.shape[-1]
    Tx = encoder_outputs.shape[1]
    V = params["emb"].shape[0]

    ids = input_ids.astype(jnp.int32).reshape(B)
    h0 = hidden[0]

    # ---------------------------------------------- kernel 1: decode step --
    def const_spec(shape):
        zeros = (0,) * len(shape)
        return pl.BlockSpec(shape, lambda i: zeros)

    step_in_specs = [
        pl.BlockSpec(memory_space=pltpu.MemorySpace.SMEM),   # ids (scalars)
        const_spec((B, H)),                                  # h0
        const_spec((B, Tx, H)),                              # encoder_outputs
        const_spec((2 * H, Tx)), const_spec((1, Tx)),        # attn
        const_spec((2 * H, H)), const_spec((1, H)),          # attn_combine
        const_spec((1, H)), const_spec((1, H)),              # bn gamma / beta
        const_spec((3, H, H)), const_spec((3, H, H)),        # GRU W_ih, W_hh
        const_spec((3, 1, H)), const_spec((3, 1, H)),        # GRU biases
        pl.BlockSpec(memory_space=pl.ANY),                   # embedding table (HBM)
    ]
    step_out_specs = [const_spec((B, H)), const_spec((B, Tx))]
    step_out_shapes = (jax.ShapeDtypeStruct((B, H), jnp.float32),
                       jax.ShapeDtypeStruct((B, Tx), jnp.float32))

    step_block_bytes = 4 * (2 * B * H + B * Tx * H + 2 * H * Tx + Tx
                            + 2 * H * H + H + 2 * H
                            + 6 * H * H + 6 * H + B * Tx + B * H)

    hnew, attn_w = pl.pallas_call(
        decoder_step_kernel,
        out_shape=step_out_shapes,
        grid_spec=pltpu.PrefetchScalarGridSpec(
            num_scalar_prefetch=0,
            grid=(1,),
            in_specs=step_in_specs,
            out_specs=step_out_specs,
            scratch_shapes=[pltpu.VMEM((B, H), jnp.float32),   # gathered emb rows
                            pltpu.SemaphoreType.DMA((B,))],    # per-row gather sems
        ),
        input_output_aliases={1: 0},            # h0 HBM buffer reused for new hidden
        compiler_params=pltpu.CompilerParams(
            dimension_semantics=("arbitrary",),
            vmem_limit_bytes=_vmem_limit(step_block_bytes),
        ),
    )(ids, h0, encoder_outputs,
      params["attn_w"], params["attn_b"],
      params["comb_w"], params["comb_b"],
      params["bn_g"], params["bn_b"],
      params["w_ih"], params["w_hh"], params["b_ih"], params["b_hh"],
      params["emb"])

    # ----------------------------- kernel 2: V-tiled output projection -----
    tv = _pick_v_tile(V)
    Vp = _round_up(V, tv)
    num_tiles = Vp // tv

    # bf16 weight storage halves the dominant HBM stream; pad V to a tile
    # multiple (padded bias columns = -1e30 so they vanish in the LSE).
    # NOTE: with params closed over under jit this pad/cast constant-folds at
    # compile time; in a real serving loop hoist it out of the decode step.
    out_w_p = jnp.zeros((H, Vp), jnp.bfloat16).at[:, :V].set(
        params["out_w"].astype(jnp.bfloat16))
    out_b_p = jnp.full((1, Vp), -1e30, jnp.float32).at[:, :V].set(
        params["out_b"].astype(jnp.float32))
    h_bf16 = hnew.astype(jnp.bfloat16)

    proj_block_bytes = (H * tv * 2          # out_w tile (bf16)
                        + tv * 4            # out_b tile
                        + B * tv * 4        # logits tile
                        + B * H * 2         # hnew (bf16)
                        + B * 4)            # lse partial

    logits, lse_parts = pl.pallas_call(
        out_proj_kernel,
        out_shape=(jax.ShapeDtypeStruct((B, Vp), jnp.float32),
                   jax.ShapeDtypeStruct((num_tiles, B, 1), jnp.float32)),
        grid_spec=pltpu.PrefetchScalarGridSpec(
            num_scalar_prefetch=0,
            grid=(num_tiles,),
            in_specs=[pl.BlockSpec((B, H), lambda j: (0, 0)),      # hnew (bf16)
                      pl.BlockSpec((H, tv), lambda j: (0, j)),     # out_w streamed
                      pl.BlockSpec((1, tv), lambda j: (0, j))],    # out_b streamed
            out_specs=[pl.BlockSpec((B, tv), lambda j: (0, j)),    # raw logits tile
                       pl.BlockSpec((1, B, 1), lambda j: (j, 0, 0))],  # LSE partial
        ),
        compiler_params=pltpu.CompilerParams(
            dimension_semantics=("parallel",),   # tiles are independent -> 2 TCs on v7x
            vmem_limit_bytes=_vmem_limit(proj_block_bytes),
        ),
    )(h_bf16, out_w_p, out_b_p)

    # log_softmax finalize: combine per-tile partial LSEs + subtract (trivial
    # XLA elementwise work; keeps the kernel free of any resident (B, V) block).
    lse = jax.nn.logsumexp(lse_parts[:, :, 0], axis=0)        # (B,)
    logp = logits[:, :V] - lse[:, None]                       # (B, V)

    return logp, hnew.reshape(1, B, H), attn_w


# --------------------------------------------------------------------------
# Parameter init (mirrors torch defaults) and a pure-JAX reference.
# --------------------------------------------------------------------------
def init_params(key, hidden_size, output_size, max_length):
    H, V, Tx = hidden_size, output_size, max_length
    ks = jax.random.split(key, 12)

    def unif(k, shape, fan_in):
        bound = 1.0 / jnp.sqrt(fan_in)
        return jax.random.uniform(k, shape, jnp.float32, -bound, bound)

    return {
        "emb": jax.random.normal(ks[0], (V, H), jnp.float32),
        "attn_w": unif(ks[1], (2 * H, Tx), 2 * H),
        "attn_b": unif(ks[2], (1, Tx), 2 * H),
        "comb_w": unif(ks[3], (2 * H, H), 2 * H),
        "comb_b": unif(ks[4], (1, H), 2 * H),
        "bn_g": jnp.ones((1, H), jnp.float32),
        "bn_b": jnp.zeros((1, H), jnp.float32),
        "w_ih": unif(ks[5], (3, H, H), H),
        "w_hh": unif(ks[6], (3, H, H), H),
        "b_ih": unif(ks[7], (3, 1, H), H),
        "b_hh": unif(ks[8], (3, 1, H), H),
        "out_w": unif(ks[9], (H, V), H),
        "out_b": unif(ks[10], (1, V), H),
    }


def reference_forward(input_ids, hidden, encoder_outputs, params):
    emb = params["emb"][input_ids]                       # (B, H)
    h0 = hidden[0]
    attn_logits = jnp.concatenate([emb, h0], axis=1) @ params["attn_w"] + params["attn_b"]
    attn_w = jax.nn.softmax(attn_logits, axis=1)
    attn_applied = jnp.einsum("bt,bth->bh", attn_w, encoder_outputs)
    comb = jnp.concatenate([emb, attn_applied], axis=1) @ params["comb_w"] + params["comb_b"]
    act = jax.nn.relu(comb)
    mean = act.mean(axis=0, keepdims=True)
    var = ((act - mean) ** 2).mean(axis=0, keepdims=True)
    bn = params["bn_g"] * (act - mean) * lax.rsqrt(var + 1e-5) + params["bn_b"]
    gi = [bn @ params["w_ih"][g] + params["b_ih"][g] for g in range(3)]
    gh = [h0 @ params["w_hh"][g] + params["b_hh"][g] for g in range(3)]
    r = jax.nn.sigmoid(gi[0] + gh[0])
    z = jax.nn.sigmoid(gi[1] + gh[1])
    n = jnp.tanh(gi[2] + r * gh[2])
    hnew = (1.0 - z) * n + z * h0
    logp = jax.nn.log_softmax(hnew @ params["out_w"] + params["out_b"], axis=1)
    return logp, hnew[None], attn_w


if __name__ == "__main__":
    # Small shapes consistent with the module's forward (one decode step).
    B, H, Tx, V = 4, 32, 8, 16

    key = jax.random.PRNGKey(0)
    k_par, k_ids, k_hid, k_enc = jax.random.split(key, 4)

    params = init_params(k_par, hidden_size=H, output_size=V, max_length=Tx)

    input_ids = jax.random.randint(k_ids, (B,), 0, V, dtype=jnp.int32)
    hidden = jax.random.normal(k_hid, (1, B, H), jnp.float32)
    encoder_outputs = jax.random.normal(k_enc, (B, Tx, H), jnp.float32)

    fwd = jax.jit(functools.partial(attn_decoder_forward, params=params))
    logp, new_hidden, attn_w = fwd(input_ids, hidden, encoder_outputs)
    jax.block_until_ready((logp, new_hidden, attn_w))

    # Structural checks.
    assert logp.shape == (B, V) and new_hidden.shape == (1, B, H) and attn_w.shape == (B, Tx)
    assert bool(jnp.all(jnp.isfinite(logp)))
    assert bool(jnp.all(jnp.isfinite(new_hidden)))
    assert bool(jnp.allclose(jnp.sum(attn_w, axis=1), 1.0, atol=1e-5))
    assert bool(jnp.allclose(jnp.sum(jnp.exp(logp), axis=1), 1.0, atol=1e-3))

    # Numerical check against a pure-JAX reference (bf16 out_w -> looser logp tol).
    ref_logp, ref_h, ref_aw = reference_forward(input_ids, hidden, encoder_outputs, params)
    assert bool(jnp.allclose(attn_w, ref_aw, atol=1e-5))
    assert bool(jnp.allclose(new_hidden, ref_h, atol=1e-4))
    assert bool(jnp.allclose(logp, ref_logp, atol=5e-2))

    print("KERNEL_OK")
</pallas_src>

<mosaic_0001>
module attributes {stable_mosaic.version = 11 : i64} {
  func.func @out_proj_kernel(%arg0: i32, %arg1: memref<4x32xbf16, #tpu.memory_space<vmem>>, %arg2: memref<32x128xbf16, #tpu.memory_space<vmem>>, %arg3: memref<1x128xf32, #tpu.memory_space<vmem>>, %arg4: memref<4x128xf32, #tpu.memory_space<vmem>>, %arg5: memref<1x4x1xf32, #tpu.memory_space<vmem>>) attributes {dimension_semantics = [#tpu.dimension_semantics<parallel>], iteration_bounds = array<i64: 1>, scalar_prefetch = 0 : i64, scratch_operands = 0 : i64, tpu.core_type = #tpu.core_type<tc>, window_params = [{pipeline_mode = #tpu.pipeline_mode<synchronous>, transform_indices = @transform_0, window_bounds = array<i64: 4, 32>}, {transform_indices = @transform_1, window_bounds = array<i64: 32, 128>}, {transform_indices = @transform_2, window_bounds = array<i64: 1, 128>}, {transform_indices = @transform_3, window_bounds = array<i64: 4, 128>}, {transform_indices = @transform_4, window_bounds = array<i64: 1, 4, 1>}]} {
    %c0 = arith.constant 0 : index
    %c0_0 = arith.constant 0 : index
    %0 = vector.load %arg1[%c0, %c0_0] : memref<4x32xbf16, #tpu.memory_space<vmem>>, vector<4x32xbf16>
    %c0_1 = arith.constant 0 : index
    %c0_2 = arith.constant 0 : index
    %1 = vector.load %arg2[%c0_1, %c0_2] : memref<32x128xbf16, #tpu.memory_space<vmem>>, vector<32x128xbf16>
    %cst = arith.constant dense<0.000000e+00> : vector<4x128xf32>
    %2 = tpu.matmul %0, %1, %cst {dimension_numbers = #tpu.dot_dimension_numbers<[1], [0], [0], [1], [0, 0, 1, 1], [], []>} : vector<4x32xbf16>, vector<32x128xbf16>, vector<4x128xf32> -> vector<4x128xf32>
    %c0_3 = arith.constant 0 : index
    %c0_4 = arith.constant 0 : index
    %3 = vector.load %arg3[%c0_3, %c0_4] : memref<1x128xf32, #tpu.memory_space<vmem>>, vector<1x128xf32>
    %4 = vector.broadcast %3 : vector<1x128xf32> to vector<4x128xf32>
    %5 = arith.addf %2, %4 : vector<4x128xf32>
    %c0_5 = arith.constant 0 : index
    %c0_6 = arith.constant 0 : index
    %6 = vector.load %arg4[%c0_5, %c0_6] : memref<4x128xf32, #tpu.memory_space<vmem>>, vector<4x128xf32>
    tpu.vector_store %arg4[%c0_5, %c0_6], %5 {strides = array<i32>} : memref<4x128xf32, #tpu.memory_space<vmem>>, vector<4x128xf32>,
    %cst_7 = arith.constant dense<0xFF800000> : vector<4xf32>
    %7 = vector.multi_reduction <maximumf>, %5, %cst_7 [1] : vector<4x128xf32> to vector<4xf32>
    %8 = vector.shape_cast %7 : vector<4xf32> to vector<4x1xf32>
    %9 = vector.broadcast %8 : vector<4x1xf32> to vector<4x128xf32>
    %10 = arith.subf %5, %9 : vector<4x128xf32>
    %11 = math.exp %10 : vector<4x128xf32>
    %cst_8 = arith.constant dense<0.000000e+00> : vector<4xf32>
    %12 = vector.multi_reduction <add>, %11, %cst_8 [1] : vector<4x128xf32> to vector<4xf32>
    %13 = vector.shape_cast %12 : vector<4xf32> to vector<4x1xf32>
    %14 = math.log %13 : vector<4x1xf32>
    %15 = arith.addf %8, %14 : vector<4x1xf32>
    %c0_9 = arith.constant 0 : index
    %c0_10 = arith.constant 0 : index
    %c0_11 = arith.constant 0 : index
    %16 = vector.load %arg5[%c0_9, %c0_10, %c0_11] : memref<1x4x1xf32, #tpu.memory_space<vmem>>, vector<1x4x1xf32>
    %17 = vector.shape_cast %16 : vector<1x4x1xf32> to vector<4x1xf32>
    %18 = vector.shape_cast %15 : vector<4x1xf32> to vector<1x4x1xf32>
    tpu.vector_store %arg5[%c0_9, %c0_10, %c0_11], %18 {strides = array<i32>} : memref<1x4x1xf32, #tpu.memory_space<vmem>>, vector<1x4x1xf32>,
    return
  }
  func.func @transform_0(%arg0: i32) -> (i32, i32) {
    %c0_i32 = arith.constant 0 : i32
    %c0_i32_0 = arith.constant 0 : i32
    %c0_i32_1 = arith.constant 0 : i32
    return %c0_i32, %c0_i32_0 : i32, i32
  }
  func.func @transform_1(%arg0: i32) -> (i32, i32) {
    %c0_i32 = arith.constant 0 : i32
    %c0_i32_0 = arith.constant 0 : i32
    return %c0_i32, %arg0 : i32, i32
  }
  func.func @transform_2(%arg0: i32) -> (i32, i32) {
    %c0_i32 = arith.constant 0 : i32
    %c0_i32_0 = arith.constant 0 : i32
    return %c0_i32, %arg0 : i32, i32
  }
  func.func @transform_3(%arg0: i32) -> (i32, i32) {
    %c0_i32 = arith.constant 0 : i32
    %c0_i32_0 = arith.constant 0 : i32
    return %c0_i32, %arg0 : i32, i32
  }
  func.func @transform_4(%arg0: i32) -> (i32, i32, i32) {
    %c0_i32 = arith.constant 0 : i32
    %c0_i32_0 = arith.constant 0 : i32
    %c0_i32_1 = arith.constant 0 : i32
    return %arg0, %c0_i32, %c0_i32_0 : i32, i32, i32
  }
}

module attributes {stable_mosaic.version = 11 : i64} {
  func.func @decoder_step_kernel(%arg0: i32, %arg1: memref<4xi32, #tpu.memory_space<smem>>, %arg2: memref<4x32xf32, #tpu.memory_space<vmem>>, %arg3: memref<4x8x32xf32, #tpu.memory_space<vmem>>, %arg4: memref<64x8xf32, #tpu.memory_space<vmem>>, %arg5: memref<1x8xf32, #tpu.memory_space<vmem>>, %arg6: memref<64x32xf32, #tpu.memory_space<vmem>>, %arg7: memref<1x32xf32, #tpu.memory_space<vmem>>, %arg8: memref<1x32xf32, #tpu.memory_space<vmem>>, %arg9: memref<1x32xf32, #tpu.memory_space<vmem>>, %arg10: memref<3x32x32xf32, #tpu.memory_space<vmem>>, %arg11: memref<3x32x32xf32, #tpu.memory_space<vmem>>, %arg12: memref<3x1x32xf32, #tpu.memory_space<vmem>>, %arg13: memref<3x1x32xf32, #tpu.memory_space<vmem>>, %arg14: memref<16x32xf32, #tpu.memory_space<any>>, %arg15: memref<4x32xf32, #tpu.memory_space<vmem>>, %arg16: memref<4x8xf32, #tpu.memory_space<vmem>>, %arg17: memref<4x32xf32, #tpu.memory_space<vmem>>, %arg18: memref<4x!tpu.dma_semaphore, #tpu.memory_space<semaphore_mem>>) attributes {dimension_semantics = [#tpu.dimension_semantics<arbitrary>], iteration_bounds = array<i64: 1>, scalar_prefetch = 0 : i64, scratch_operands = 2 : i64, tpu.core_type = #tpu.core_type<tc>, window_params = [{transform_indices = @transform_0, window_bounds = array<i64: 4>}, {pipeline_mode = #tpu.pipeline_mode<synchronous>, transform_indices = @transform_1, window_bounds = array<i64: 4, 32>}, {pipeline_mode = #tpu.pipeline_mode<synchronous>, transform_indices = @transform_2, window_bounds = array<i64: 4, 8, 32>}, {pipeline_mode = #tpu.pipeline_mode<synchronous>, transform_indices = @transform_3, window_bounds = array<i64: 64, 8>}, {pipeline_mode = #tpu.pipeline_mode<synchronous>, transform_indices = @transform_4, window_bounds = array<i64: 1, 8>}, {pipeline_mode = #tpu.pipeline_mode<synchronous>, transform_indices = @transform_5, window_bounds = array<i64: 64, 32>}, {pipeline_mode = #tpu.pipeline_mode<synchronous>, transform_indices = @transform_6, window_bounds = array<i64: 1, 32>}, {pipeline_mode = #tpu.pipeline_mode<synchronous>, transform_indices = @transform_7, window_bounds = array<i64: 1, 32>}, {pipeline_mode = #tpu.pipeline_mode<synchronous>, transform_indices = @transform_8, window_bounds = array<i64: 1, 32>}, {pipeline_mode = #tpu.pipeline_mode<synchronous>, transform_indices = @transform_9, window_bounds = array<i64: 3, 32, 32>}, {pipeline_mode = #tpu.pipeline_mode<synchronous>, transform_indices = @transform_10, window_bounds = array<i64: 3, 32, 32>}, {pipeline_mode = #tpu.pipeline_mode<synchronous>, transform_indices = @transform_11, window_bounds = array<i64: 3, 1, 32>}, {pipeline_mode = #tpu.pipeline_mode<synchronous>, transform_indices = @transform_12, window_bounds = array<i64: 3, 1, 32>}, {}, {pipeline_mode = #tpu.pipeline_mode<synchronous>, transform_indices = @transform_14, window_bounds = array<i64: 4, 32>}, {pipeline_mode = #tpu.pipeline_mode<synchronous>, transform_indices = @transform_15, window_bounds = array<i64: 4, 8>}]} {
    %c0 = arith.constant 0 : index
    %0 = memref.load %arg1[%c0] : memref<4xi32, #tpu.memory_space<smem>>
    %c0_i32 = arith.constant 0 : i32
    %c0_i32_0 = arith.constant 0 : i32
    %1 = tpu.memref_slice %arg14[%0, %c0_i32_0] : memref<16x32xf32, #tpu.memory_space<any>> -> memref<1x32xf32, #tpu.memory_space<any>>
    %c0_i32_1 = arith.constant 0 : i32
    %c0_i32_2 = arith.constant 0 : i32
    %2 = tpu.memref_slice %arg17[%c0_i32_1, %c0_i32_2] : memref<4x32xf32, #tpu.memory_space<vmem>> -> memref<1x32xf32, #tpu.memory_space<vmem>>
    %3 = tpu.memref_slice %arg18[%c0_i32] : memref<4x!tpu.dma_semaphore, #tpu.memory_space<semaphore_mem>> -> memref<1x!tpu.dma_semaphore, #tpu.memory_space<semaphore_mem>>
    %4 = tpu.memref_squeeze %3 : memref<1x!tpu.dma_semaphore, #tpu.memory_space<semaphore_mem>> -> memref<!tpu.dma_semaphore, #tpu.memory_space<semaphore_mem>>
    tpu.enqueue_dma source(%1 : memref<1x32xf32, #tpu.memory_space<any>>) target(%2 : memref<1x32xf32, #tpu.memory_space<vmem>>) target_semaphore(%4 : memref<!tpu.dma_semaphore, #tpu.memory_space<semaphore_mem>>)
    %c1 = arith.constant 1 : index
    %5 = memref.load %arg1[%c1] : memref<4xi32, #tpu.memory_space<smem>>
    %c1_i32 = arith.constant 1 : i32
    %c0_i32_3 = arith.constant 0 : i32
    %6 = tpu.memref_slice %arg14[%5, %c0_i32_3] : memref<16x32xf32, #tpu.memory_space<any>> -> memref<1x32xf32, #tpu.memory_space<any>>
    %c1_i32_4 = arith.constant 1 : i32
    %c0_i32_5 = arith.constant 0 : i32
    %7 = tpu.memref_slice %arg17[%c1_i32_4, %c0_i32_5] : memref<4x32xf32, #tpu.memory_space<vmem>> -> memref<1x32xf32, #tpu.memory_space<vmem>>
    %8 = tpu.memref_slice %arg18[%c1_i32] : memref<4x!tpu.dma_semaphore, #tpu.memory_space<semaphore_mem>> -> memref<1x!tpu.dma_semaphore, #tpu.memory_space<semaphore_mem>>
    %9 = tpu.memref_squeeze %8 : memref<1x!tpu.dma_semaphore, #tpu.memory_space<semaphore_mem>> -> memref<!tpu.dma_semaphore, #tpu.memory_space<semaphore_mem>>
    tpu.enqueue_dma source(%6 : memref<1x32xf32, #tpu.memory_space<any>>) target(%7 : memref<1x32xf32, #tpu.memory_space<vmem>>) target_semaphore(%9 : memref<!tpu.dma_semaphore, #tpu.memory_space<semaphore_mem>>)
    %c2 = arith.constant 2 : index
    %10 = memref.load %arg1[%c2] : memref<4xi32, #tpu.memory_space<smem>>
    %c2_i32 = arith.constant 2 : i32
    %c0_i32_6 = arith.constant 0 : i32
    %11 = tpu.memref_slice %arg14[%10, %c0_i32_6] : memref<16x32xf32, #tpu.memory_space<any>> -> memref<1x32xf32, #tpu.memory_space<any>>
    %c2_i32_7 = arith.constant 2 : i32
    %c0_i32_8 = arith.constant 0 : i32
    %12 = tpu.memref_slice %arg17[%c2_i32_7, %c0_i32_8] : memref<4x32xf32, #tpu.memory_space<vmem>> -> memref<1x32xf32, #tpu.memory_space<vmem>>
    %13 = tpu.memref_slice %arg18[%c2_i32] : memref<4x!tpu.dma_semaphore, #tpu.memory_space<semaphore_mem>> -> memref<1x!tpu.dma_semaphore, #tpu.memory_space<semaphore_mem>>
    %14 = tpu.memref_squeeze %13 : memref<1x!tpu.dma_semaphore, #tpu.memory_space<semaphore_mem>> -> memref<!tpu.dma_semaphore, #tpu.memory_space<semaphore_mem>>
    tpu.enqueue_dma source(%11 : memref<1x32xf32, #tpu.memory_space<any>>) target(%12 : memref<1x32xf32, #tpu.memory_space<vmem>>) target_semaphore(%14 : memref<!tpu.dma_semaphore, #tpu.memory_space<semaphore_mem>>)
    %c3 = arith.constant 3 : index
    %15 = memref.load %arg1[%c3] : memref<4xi32, #tpu.memory_space<smem>>
    %c3_i32 = arith.constant 3 : i32
    %c0_i32_9 = arith.constant 0 : i32
    %16 = tpu.memref_slice %arg14[%15, %c0_i32_9] : memref<16x32xf32, #tpu.memory_space<any>> -> memref<1x32xf32, #tpu.memory_space<any>>
    %c3_i32_10 = arith.constant 3 : i32
    %c0_i32_11 = arith.constant 0 : i32
    %17 = tpu.memref_slice %arg17[%c3_i32_10, %c0_i32_11] : memref<4x32xf32, #tpu.memory_space<vmem>> -> memref<1x32xf32, #tpu.memory_space<vmem>>
    %18 = tpu.memref_slice %arg18[%c3_i32] : memref<4x!tpu.dma_semaphore, #tpu.memory_space<semaphore_mem>> -> memref<1x!tpu.dma_semaphore, #tpu.memory_space<semaphore_mem>>
    %19 = tpu.memref_squeeze %18 : memref<1x!tpu.dma_semaphore, #tpu.memory_space<semaphore_mem>> -> memref<!tpu.dma_semaphore, #tpu.memory_space<semaphore_mem>>
    tpu.enqueue_dma source(%16 : memref<1x32xf32, #tpu.memory_space<any>>) target(%17 : memref<1x32xf32, #tpu.memory_space<vmem>>) target_semaphore(%19 : memref<!tpu.dma_semaphore, #tpu.memory_space<semaphore_mem>>)
    %c0_12 = arith.constant 0 : index
    %c0_13 = arith.constant 0 : index
    %20 = vector.load %arg2[%c0_12, %c0_13] : memref<4x32xf32, #tpu.memory_space<vmem>>, vector<4x32xf32>
    %c32 = arith.constant 32 : index
    %c0_14 = arith.constant 0 : index
    %21 = vector.load %arg4[%c32, %c0_14] : memref<64x8xf32, #tpu.memory_space<vmem>>, vector<32x8xf32>
    %cst = arith.constant dense<0.000000e+00> : vector<4x8xf32>
    %22 = tpu.matmul %20, %21, %cst {dimension_numbers = #tpu.dot_dimension_numbers<[1], [0], [0], [1], [0, 0, 1, 1], [], []>} : vector<4x32xf32>, vector<32x8xf32>, vector<4x8xf32> -> vector<4x8xf32>
    %c0_15 = arith.constant 0 : index
    %c0_16 = arith.constant 0 : index
    %c0_17 = arith.constant 0 : index
    %23 = vector.load %arg11[%c0_15, %c0_16, %c0_17] : memref<3x32x32xf32, #tpu.memory_space<vmem>>, vector<1x32x32xf32>
    %24 = vector.shape_cast %23 : vector<1x32x32xf32> to vector<32x32xf32>
    %cst_18 = arith.constant dense<0.000000e+00> : vector<4x32xf32>
    %25 = tpu.matmul %20, %24, %cst_18 {dimension_numbers = #tpu.dot_dimension_numbers<[1], [0], [0], [1], [0, 0, 1, 1], [], []>} : vector<4x32xf32>, vector<32x32xf32>, vector<4x32xf32> -> vector<4x32xf32>
    %c0_19 = arith.constant 0 : index
    %c0_20 = arith.constant 0 : index
    %c0_21 = arith.constant 0 : index
    %26 = vector.load %arg13[%c0_19, %c0_20, %c0_21] : memref<3x1x32xf32, #tpu.memory_space<vmem>>, vector<1x1x32xf32>
    %27 = vector.shape_cast %26 : vector<1x1x32xf32> to vector<1x32xf32>
    %28 = vector.broadcast %27 : vector<1x32xf32> to vector<4x32xf32>
    %29 = arith.addf %25, %28 : vector<4x32xf32>
    %c1_22 = arith.constant 1 : index
    %c0_23 = arith.constant 0 : index
    %c0_24 = arith.constant 0 : index
    %30 = vector.load %arg11[%c1_22, %c0_23, %c0_24] : memref<3x32x32xf32, #tpu.memory_space<vmem>>, vector<1x32x32xf32>
    %31 = vector.shape_cast %30 : vector<1x32x32xf32> to vector<32x32xf32>
    %cst_25 = arith.constant dense<0.000000e+00> : vector<4x32xf32>
    %32 = tpu.matmul %20, %31, %cst_25 {dimension_numbers = #tpu.dot_dimension_numbers<[1], [0], [0], [1], [0, 0, 1, 1], [], []>} : vector<4x32xf32>, vector<32x32xf32>, vector<4x32xf32> -> vector<4x32xf32>
    %c1_26 = arith.constant 1 : index
    %c0_27 = arith.constant 0 : index
    %c0_28 = arith.constant 0 : index
    %33 = vector.load %arg13[%c1_26, %c0_27, %c0_28] : memref<3x1x32xf32, #tpu.memory_space<vmem>>, vector<1x1x32xf32>
    %34 = vector.shape_cast %33 : vector<1x1x32xf32> to vector<1x32xf32>
    %35 = vector.broadcast %34 : vector<1x32xf32> to vector<4x32xf32>
    %36 = arith.addf %32, %35 : vector<4x32xf32>
    %c2_29 = arith.constant 2 : index
    %c0_30 = arith.constant 0 : index
    %c0_31 = arith.constant 0 : index
    %37 = vector.load %arg11[%c2_29, %c0_30, %c0_31] : memref<3x32x32xf32, #tpu.memory_space<vmem>>, vector<1x32x32xf32>
    %38 = vector.shape_cast %37 : vector<1x32x32xf32> to vector<32x32xf32>
    %cst_32 = arith.constant dense<0.000000e+00> : vector<4x32xf32>
    %39 = tpu.matmul %20, %38, %cst_32 {dimension_numbers = #tpu.dot_dimension_numbers<[1], [0], [0], [1], [0, 0, 1, 1], [], []>} : vector<4x32xf32>, vector<32x32xf32>, vector<4x32xf32> -> vector<4x32xf32>
    %c2_33 = arith.constant 2 : index
    %c0_34 = arith.constant 0 : index
    %c0_35 = arith.constant 0 : index
    %40 = vector.load %arg13[%c2_33, %c0_34, %c0_35] : memref<3x1x32xf32, #tpu.memory_space<vmem>>, vector<1x1x32xf32>
    %41 = vector.shape_cast %40 : vector<1x1x32xf32> to vector<1x32xf32>
    %42 = vector.broadcast %41 : vector<1x32xf32> to vector<4x32xf32>
    %43 = arith.addf %39, %42 : vector<4x32xf32>
    %c0_i32_36 = arith.constant 0 : i32
    %c0_i32_37 = arith.constant 0 : i32
    %44 = tpu.memref_slice %arg14[%0, %c0_i32_37] : memref<16x32xf32, #tpu.memory_space<any>> -> memref<1x32xf32, #tpu.memory_space<any>>
    %c0_i32_38 = arith.constant 0 : i32
    %c0_i32_39 = arith.constant 0 : i32
    %45 = tpu.memref_slice %arg17[%c0_i32_38, %c0_i32_39] : memref<4x32xf32, #tpu.memory_space<vmem>> -> memref<1x32xf32, #tpu.memory_space<vmem>>
    %46 = tpu.memref_slice %arg18[%c0_i32_36] : memref<4x!tpu.dma_semaphore, #tpu.memory_space<semaphore_mem>> -> memref<1x!tpu.dma_semaphore, #tpu.memory_space<semaphore_mem>>
    %47 = tpu.memref_squeeze %46 : memref<1x!tpu.dma_semaphore, #tpu.memory_space<semaphore_mem>> -> memref<!tpu.dma_semaphore, #tpu.memory_space<semaphore_mem>>
    tpu.wait_dma2 semaphore(%47 : memref<!tpu.dma_semaphore, #tpu.memory_space<semaphore_mem>>) src(%44 : memref<1x32xf32, #tpu.memory_space<any>>) dst(%45 : memref<1x32xf32, #tpu.memory_space<vmem>>)
    %c1_i32_40 = arith.constant 1 : i32
    %c0_i32_41 = arith.constant 0 : i32
    %48 = tpu.memref_slice %arg14[%5, %c0_i32_41] : memref<16x32xf32, #tpu.memory_space<any>> -> memref<1x32xf32, #tpu.memory_space<any>>
    %c1_i32_42 = arith.constant 1 : i32
    %c0_i32_43 = arith.constant 0 : i32
    %49 = tpu.memref_slice %arg17[%c1_i32_42, %c0_i32_43] : memref<4x32xf32, #tpu.memory_space<vmem>> -> memref<1x32xf32, #tpu.memory_space<vmem>>
    %50 = tpu.memref_slice %arg18[%c1_i32_40] : memref<4x!tpu.dma_semaphore, #tpu.memory_space<semaphore_mem>> -> memref<1x!tpu.dma_semaphore, #tpu.memory_space<semaphore_mem>>
    %51 = tpu.memref_squeeze %50 : memref<1x!tpu.dma_semaphore, #tpu.memory_space<semaphore_mem>> -> memref<!tpu.dma_semaphore, #tpu.memory_space<semaphore_mem>>
    tpu.wait_dma2 semaphore(%51 : memref<!tpu.dma_semaphore, #tpu.memory_space<semaphore_mem>>) src(%48 : memref<1x32xf32, #tpu.memory_space<any>>) dst(%49 : memref<1x32xf32, #tpu.memory_space<vmem>>)
    %c2_i32_44 = arith.constant 2 : i32
    %c0_i32_45 = arith.constant 0 : i32
    %52 = tpu.memref_slice %arg14[%10, %c0_i32_45] : memref<16x32xf32, #tpu.memory_space<any>> -> memref<1x32xf32, #tpu.memory_space<any>>
    %c2_i32_46 = arith.constant 2 : i32
    %c0_i32_47 = arith.constant 0 : i32
    %53 = tpu.memref_slice %arg17[%c2_i32_46, %c0_i32_47] : memref<4x32xf32, #tpu.memory_space<vmem>> -> memref<1x32xf32, #tpu.memory_space<vmem>>
    %54 = tpu.memref_slice %arg18[%c2_i32_44] : memref<4x!tpu.dma_semaphore, #tpu.memory_space<semaphore_mem>> -> memref<1x!tpu.dma_semaphore, #tpu.memory_space<semaphore_mem>>
    %55 = tpu.memref_squeeze %54 : memref<1x!tpu.dma_semaphore, #tpu.memory_space<semaphore_mem>> -> memref<!tpu.dma_semaphore, #tpu.memory_space<semaphore_mem>>
    tpu.wait_dma2 semaphore(%55 : memref<!tpu.dma_semaphore, #tpu.memory_space<semaphore_mem>>) src(%52 : memref<1x32xf32, #tpu.memory_space<any>>) dst(%53 : memref<1x32xf32, #tpu.memory_space<vmem>>)
    %c3_i32_48 = arith.constant 3 : i32
    %c0_i32_49 = arith.constant 0 : i32
    %56 = tpu.memref_slice %arg14[%15, %c0_i32_49] : memref<16x32xf32, #tpu.memory_space<any>> -> memref<1x32xf32, #tpu.memory_space<any>>
    %c3_i32_50 = arith.constant 3 : i32
    %c0_i32_51 = arith.constant 0 : i32
    %57 = tpu.memref_slice %arg17[%c3_i32_50, %c0_i32_51] : memref<4x32xf32, #tpu.memory_space<vmem>> -> memref<1x32xf32, #tpu.memory_space<vmem>>
    %58 = tpu.memref_slice %arg18[%c3_i32_48] : memref<4x!tpu.dma_semaphore, #tpu.memory_space<semaphore_mem>> -> memref<1x!tpu.dma_semaphore, #tpu.memory_space<semaphore_mem>>
    %59 = tpu.memref_squeeze %58 : memref<1x!tpu.dma_semaphore, #tpu.memory_space<semaphore_mem>> -> memref<!tpu.dma_semaphore, #tpu.memory_space<semaphore_mem>>
    tpu.wait_dma2 semaphore(%59 : memref<!tpu.dma_semaphore, #tpu.memory_space<semaphore_mem>>) src(%56 : memref<1x32xf32, #tpu.memory_space<any>>) dst(%57 : memref<1x32xf32, #tpu.memory_space<vmem>>)
    %c0_52 = arith.constant 0 : index
    %c0_53 = arith.constant 0 : index
    %60 = vector.load %arg17[%c0_52, %c0_53] : memref<4x32xf32, #tpu.memory_space<vmem>>, vector<4x32xf32>
    %c0_54 = arith.constant 0 : index
    %c0_55 = arith.constant 0 : index
    %61 = vector.load %arg4[%c0_54, %c0_55] : memref<64x8xf32, #tpu.memory_space<vmem>>, vector<32x8xf32>
    %cst_56 = arith.constant dense<0.000000e+00> : vector<4x8xf32>
    %62 = tpu.matmul %60, %61, %cst_56 {dimension_numbers = #tpu.dot_dimension_numbers<[1], [0], [0], [1], [0, 0, 1, 1], [], []>} : vector<4x32xf32>, vector<32x8xf32>, vector<4x8xf32> -> vector<4x8xf32>
    %63 = arith.addf %62, %22 : vector<4x8xf32>
    %c0_57 = arith.constant 0 : index
    %c0_58 = arith.constant 0 : index
    %64 = vector.load %arg5[%c0_57, %c0_58] : memref<1x8xf32, #tpu.memory_space<vmem>>, vector<1x8xf32>
    %65 = vector.broadcast %64 : vector<1x8xf32> to vector<4x8xf32>
    %66 = arith.addf %63, %65 : vector<4x8xf32>
    %cst_59 = arith.constant dense<0xFF800000> : vector<4xf32>
    %67 = vector.multi_reduction <maximumf>, %66, %cst_59 [1] : vector<4x8xf32> to vector<4xf32>
    %68 = vector.shape_cast %67 : vector<4xf32> to vector<4x1xf32>
    %69 = vector.broadcast %68 : vector<4x1xf32> to vector<4x8xf32>
    %70 = arith.subf %66, %69 : vector<4x8xf32>
    %71 = math.exp %70 : vector<4x8xf32>
    %cst_60 = arith.constant dense<0.000000e+00> : vector<4xf32>
    %72 = vector.multi_reduction <add>, %71, %cst_60 [1] : vector<4x8xf32> to vector<4xf32>
    %73 = vector.shape_cast %72 : vector<4xf32> to vector<4x1xf32>
    %74 = vector.broadcast %73 : vector<4x1xf32> to vector<4x8xf32>
    %75 = arith.divf %71, %74 : vector<4x8xf32>
    %c0_61 = arith.constant 0 : index
    %c0_62 = arith.constant 0 : index
    %76 = vector.load %arg16[%c0_61, %c0_62] : memref<4x8xf32, #tpu.memory_space<vmem>>, vector<4x8xf32>
    tpu.vector_store %arg16[%c0_61, %c0_62], %75 {strides = array<i32>} : memref<4x8xf32, #tpu.memory_space<vmem>>, vector<4x8xf32>,
    %77 = vector.shape_cast %75 : vector<4x8xf32> to vector<4x1x8xf32>
    %c0_63 = arith.constant 0 : index
    %c0_64 = arith.constant 0 : index
    %c0_65 = arith.constant 0 : index
    %78 = vector.load %arg3[%c0_63, %c0_64, %c0_65] : memref<4x8x32xf32, #tpu.memory_space<vmem>>, vector<4x8x32xf32>
    "tpu.trace_start"() <{level = 10 : i32, message = "bqt,bth->bqh"}> : () -> ()
    %cst_66 = arith.constant dense<0.000000e+00> : vector<4x1x32xf32>
    %79 = tpu.matmul %77, %78, %cst_66 {dimension_numbers = #tpu.dot_dimension_numbers<[2], [1], [1], [2], [0, 0, 0, 1, 1, 2], [0], [0]>} : vector<4x1x8xf32>, vector<4x8x32xf32>, vector<4x1x32xf32> -> vector<4x1x32xf32>
    "tpu.trace_stop"() : () -> ()
    %80 = vector.shape_cast %79 : vector<4x1x32xf32> to vector<4x32xf32>
    %c0_67 = arith.constant 0 : index
    %c0_68 = arith.constant 0 : index
    %81 = vector.load %arg6[%c0_67, %c0_68] : memref<64x32xf32, #tpu.memory_space<vmem>>, vector<32x32xf32>
    %cst_69 = arith.constant dense<0.000000e+00> : vector<4x32xf32>
    %82 = tpu.matmul %60, %81, %cst_69 {dimension_numbers = #tpu.dot_dimension_numbers<[1], [0], [0], [1], [0, 0, 1, 1], [], []>} : vector<4x32xf32>, vector<32x32xf32>, vector<4x32xf32> -> vector<4x32xf32>
    %c32_70 = arith.constant 32 : index
    %c0_71 = arith.constant 0 : index
    %83 = vector.load %arg6[%c32_70, %c0_71] : memref<64x32xf32, #tpu.memory_space<vmem>>, vector<32x32xf32>
    %cst_72 = arith.constant dense<0.000000e+00> : vector<4x32xf32>
    %84 = tpu.matmul %80, %83, %cst_72 {dimension_numbers = #tpu.dot_dimension_numbers<[1], [0], [0], [1], [0, 0, 1, 1], [], []>} : vector<4x32xf32>, vector<32x32xf32>, vector<4x32xf32> -> vector<4x32xf32>
    %85 = arith.addf %82, %84 : vector<4x32xf32>
    %c0_73 = arith.constant 0 : index
    %c0_74 = arith.constant 0 : index
    %86 = vector.load %arg7[%c0_73, %c0_74] : memref<1x32xf32, #tpu.memory_space<vmem>>, vector<1x32xf32>
    %87 = vector.broadcast %86 : vector<1x32xf32> to vector<4x32xf32>
    %88 = arith.addf %85, %87 : vector<4x32xf32>
    %cst_75 = arith.constant 0.000000e+00 : f32
    %89 = vector.broadcast %cst_75 : f32 to vector<4x32xf32>
    %90 = arith.maximumf %88, %89 : vector<4x32xf32>
    %cst_76 = arith.constant dense<0.000000e+00> : vector<32xf32>
    %91 = vector.multi_reduction <add>, %90, %cst_76 [0] : vector<4x32xf32> to vector<32xf32>
    %92 = vector.shape_cast %91 : vector<32xf32> to vector<1x32xf32>
    %cst_77 = arith.constant 4.000000e+00 : f32
    %93 = vector.broadcast %cst_77 : f32 to vector<1x32xf32>
    %94 = arith.divf %92, %93 : vector<1x32xf32>
    %95 = vector.broadcast %94 : vector<1x32xf32> to vector<4x32xf32>
    %96 = arith.subf %90, %95 : vector<4x32xf32>
    %97 = arith.mulf %96, %96 : vector<4x32xf32>
    %cst_78 = arith.constant dense<0.000000e+00> : vector<32xf32>
    %98 = vector.multi_reduction <add>, %97, %cst_78 [0] : vector<4x32xf32> to vector<32xf32>
    %99 = vector.shape_cast %98 : vector<32xf32> to vector<1x32xf32>
    %cst_79 = arith.constant 4.000000e+00 : f32
    %100 = vector.broadcast %cst_79 : f32 to vector<1x32xf32>
    %101 = arith.divf %99, %100 : vector<1x32xf32>
    %c0_80 = arith.constant 0 : index
    %c0_81 = arith.constant 0 : index
    %102 = vector.load %arg8[%c0_80, %c0_81] : memref<1x32xf32, #tpu.memory_space<vmem>>, vector<1x32xf32>
    %103 = vector.broadcast %94 : vector<1x32xf32> to vector<4x32xf32>
    %104 = arith.subf %90, %103 : vector<4x32xf32>
    %105 = vector.broadcast %102 : vector<1x32xf32> to vector<4x32xf32>
    %106 = arith.mulf %105, %104 : vector<4x32xf32>
    %cst_82 = arith.constant 9.99999974E-6 : f32
    %107 = vector.broadcast %cst_82 : f32 to vector<1x32xf32>
    %108 = arith.addf %101, %107 : vector<1x32xf32>
    %109 = math.rsqrt %108 : vector<1x32xf32>
    %110 = vector.broadcast %109 : vector<1x32xf32> to vector<4x32xf32>
    %111 = arith.mulf %106, %110 : vector<4x32xf32>
    %c0_83 = arith.constant 0 : index
    %c0_84 = arith.constant 0 : index
    %112 = vector.load %arg9[%c0_83, %c0_84] : memref<1x32xf32, #tpu.memory_space<vmem>>, vector<1x32xf32>
    %113 = vector.broadcast %112 : vector<1x32xf32> to vector<4x32xf32>
    %114 = arith.addf %111, %113 : vector<4x32xf32>
    %c0_85 = arith.constant 0 : index
    %c0_86 = arith.constant 0 : index
    %c0_87 = arith.constant 0 : index
    %115 = vector.load %arg10[%c0_85, %c0_86, %c0_87] : memref<3x32x32xf32, #tpu.memory_space<vmem>>, vector<1x32x32xf32>
    %116 = vector.shape_cast %115 : vector<1x32x32xf32> to vector<32x32xf32>
    %cst_88 = arith.constant dense<0.000000e+00> : vector<4x32xf32>
    %117 = tpu.matmul %114, %116, %cst_88 {dimension_numbers = #tpu.dot_dimension_numbers<[1], [0], [0], [1], [0, 0, 1, 1], [], []>} : vector<4x32xf32>, vector<32x32xf32>, vector<4x32xf32> -> vector<4x32xf32>
    %c0_89 = arith.constant 0 : index
    %c0_90 = arith.constant 0 : index
    %c0_91 = arith.constant 0 : index
    %118 = vector.load %arg12[%c0_89, %c0_90, %c0_91] : memref<3x1x32xf32, #tpu.memory_space<vmem>>, vector<1x1x32xf32>
    %119 = vector.shape_cast %118 : vector<1x1x32xf32> to vector<1x32xf32>
    %120 = vector.broadcast %119 : vector<1x32xf32> to vector<4x32xf32>
    %121 = arith.addf %117, %120 : vector<4x32xf32>
    %c1_92 = arith.constant 1 : index
    %c0_93 = arith.constant 0 : index
    %c0_94 = arith.constant 0 : index
    %122 = vector.load %arg10[%c1_92, %c0_93, %c0_94] : memref<3x32x32xf32, #tpu.memory_space<vmem>>, vector<1x32x32xf32>
    %123 = vector.shape_cast %122 : vector<1x32x32xf32> to vector<32x32xf32>
    %cst_95 = arith.constant dense<0.000000e+00> : vector<4x32xf32>
    %124 = tpu.matmul %114, %123, %cst_95 {dimension_numbers = #tpu.dot_dimension_numbers<[1], [0], [0], [1], [0, 0, 1, 1], [], []>} : vector<4x32xf32>, vector<32x32xf32>, vector<4x32xf32> -> vector<4x32xf32>
    %c1_96 = arith.constant 1 : index
    %c0_97 = arith.constant 0 : index
    %c0_98 = arith.constant 0 : index
    %125 = vector.load %arg12[%c1_96, %c0_97, %c0_98] : memref<3x1x32xf32, #tpu.memory_space<vmem>>, vector<1x1x32xf32>
    %126 = vector.shape_cast %125 : vector<1x1x32xf32> to vector<1x32xf32>
    %127 = vector.broadcast %126 : vector<1x32xf32> to vector<4x32xf32>
    %128 = arith.addf %124, %127 : vector<4x32xf32>
    %c2_99 = arith.constant 2 : index
    %c0_100 = arith.constant 0 : index
    %c0_101 = arith.constant 0 : index
    %129 = vector.load %arg10[%c2_99, %c0_100, %c0_101] : memref<3x32x32xf32, #tpu.memory_space<vmem>>, vector<1x32x32xf32>
    %130 = vector.shape_cast %129 : vector<1x32x32xf32> to vector<32x32xf32>
    %cst_102 = arith.constant dense<0.000000e+00> : vector<4x32xf32>
    %131 = tpu.matmul %114, %130, %cst_102 {dimension_numbers = #tpu.dot_dimension_numbers<[1], [0], [0], [1], [0, 0, 1, 1], [], []>} : vector<4x32xf32>, vector<32x32xf32>, vector<4x32xf32> -> vector<4x32xf32>
    %c2_103 = arith.constant 2 : index
    %c0_104 = arith.constant 0 : index
    %c0_105 = arith.constant 0 : index
    %132 = vector.load %arg12[%c2_103, %c0_104, %c0_105] : memref<3x1x32xf32, #tpu.memory_space<vmem>>, vector<1x1x32xf32>
    %133 = vector.shape_cast %132 : vector<1x1x32xf32> to vector<1x32xf32>
    %134 = vector.broadcast %133 : vector<1x32xf32> to vector<4x32xf32>
    %135 = arith.addf %131, %134 : vector<4x32xf32>
    %136 = arith.addf %121, %29 : vector<4x32xf32>
    %137 = arith.negf %136 : vector<4x32xf32>
    %138 = math.exp %137 : vector<4x32xf32>
    %cst_106 = arith.constant 1.000000e+00 : f32
    %139 = vector.broadcast %cst_106 : f32 to vector<4x32xf32>
    %140 = arith.addf %139, %138 : vector<4x32xf32>
    %141 = arith.divf %139, %140 : vector<4x32xf32>
    %142 = arith.addf %128, %36 : vector<4x32xf32>
    %143 = arith.negf %142 : vector<4x32xf32>
    %144 = math.exp %143 : vector<4x32xf32>
    %cst_107 = arith.constant 1.000000e+00 : f32
    %145 = vector.broadcast %cst_107 : f32 to vector<4x32xf32>
    %146 = arith.addf %145, %144 : vector<4x32xf32>
    %147 = arith.divf %145, %146 : vector<4x32xf32>
    %148 = arith.mulf %141, %43 : vector<4x32xf32>
    %149 = arith.addf %135, %148 : vector<4x32xf32>
    %150 = math.tanh %149 : vector<4x32xf32>
    %cst_108 = arith.constant 1.000000e+00 : f32
    %151 = vector.broadcast %cst_108 : f32 to vector<4x32xf32>
    %152 = arith.subf %151, %147 : vector<4x32xf32>
    %153 = arith.mulf %152, %150 : vector<4x32xf32>
    %154 = arith.mulf %147, %20 : vector<4x32xf32>
    %155 = arith.addf %153, %154 : vector<4x32xf32>
    %c0_109 = arith.constant 0 : index
    %c0_110 = arith.constant 0 : index
    %156 = vector.load %arg15[%c0_109, %c0_110] : memref<4x32xf32, #tpu.memory_space<vmem>>, vector<4x32xf32>
    tpu.vector_store %arg15[%c0_109, %c0_110], %155 {strides = array<i32>} : memref<4x32xf32, #tpu.memory_space<vmem>>, vector<4x32xf32>,
    return
  }
  func.func @transform_0(%arg0: i32) -> i32 {
    %c0_i32 = arith.constant 0 : i32
    %c0_i32_0 = arith.constant 0 : i32
    return %c0_i32 : i32
  }
  func.func @transform_1(%arg0: i32) -> (i32, i32) {
    %c0_i32 = arith.constant 0 : i32
    %c0_i32_0 = arith.constant 0 : i32
    %c0_i32_1 = arith.constant 0 : i32
    return %c0_i32, %c0_i32_0 : i32, i32
  }
  func.func @transform_2(%arg0: i32) -> (i32, i32, i32) {
    %c0_i32 = arith.constant 0 : i32
    %c0_i32_0 = arith.constant 0 : i32
    %c0_i32_1 = arith.constant 0 : i32
    %c0_i32_2 = arith.constant 0 : i32
    return %c0_i32, %c0_i32_0, %c0_i32_1 : i32, i32, i32
  }
  func.func @transform_3(%arg0: i32) -> (i32, i32) {
    %c0_i32 = arith.constant 0 : i32
    %c0_i32_0 = arith.constant 0 : i32
    %c0_i32_1 = arith.constant 0 : i32
    return %c0_i32, %c0_i32_0 : i32, i32
  }
  func.func @transform_4(%arg0: i32) -> (i32, i32) {
    %c0_i32 = arith.constant 0 : i32
    %c0_i32_0 = arith.constant 0 : i32
    %c0_i32_1 = arith.constant 0 : i32
    return %c0_i32, %c0_i32_0 : i32, i32
  }
  func.func @transform_5(%arg0: i32) -> (i32, i32) {
    %c0_i32 = arith.constant 0 : i32
    %c0_i32_0 = arith.constant 0 : i32
    %c0_i32_1 = arith.constant 0 : i32
    return %c0_i32, %c0_i32_0 : i32, i32
  }
  func.func @transform_6(%arg0: i32) -> (i32, i32) {
    %c0_i32 = arith.constant 0 : i32
    %c0_i32_0 = arith.constant 0 : i32
    %c0_i32_1 = arith.constant 0 : i32
    return %c0_i32, %c0_i32_0 : i32, i32
  }
  func.func @transform_7(%arg0: i32) -> (i32, i32) {
    %c0_i32 = arith.constant 0 : i32
    %c0_i32_0 = arith.constant 0 : i32
    %c0_i32_1 = arith.constant 0 : i32
    return %c0_i32, %c0_i32_0 : i32, i32
  }
  func.func @transform_8(%arg0: i32) -> (i32, i32) {
    %c0_i32 = arith.constant 0 : i32
    %c0_i32_0 = arith.constant 0 : i32
    %c0_i32_1 = arith.constant 0 : i32
    return %c0_i32, %c0_i32_0 : i32, i32
  }
  func.func @transform_9(%arg0: i32) -> (i32, i32, i32) {
    %c0_i32 = arith.constant 0 : i32
    %c0_i32_0 = arith.constant 0 : i32
    %c0_i32_1 = arith.constant 0 : i32
    %c0_i32_2 = arith.constant 0 : i32
    return %c0_i32, %c0_i32_0, %c0_i32_1 : i32, i32, i32
  }
  func.func @transform_10(%arg0: i32) -> (i32, i32, i32) {
    %c0_i32 = arith.constant 0 : i32
    %c0_i32_0 = arith.constant 0 : i32
    %c0_i32_1 = arith.constant 0 : i32
    %c0_i32_2 = arith.constant 0 : i32
    return %c0_i32, %c0_i32_0, %c0_i32_1 : i32, i32, i32
  }
  func.func @transform_11(%arg0: i32) -> (i32, i32, i32) {
    %c0_i32 = arith.constant 0 : i32
    %c0_i32_0 = arith.constant 0 : i32
    %c0_i32_1 = arith.constant 0 : i32
    %c0_i32_2 = arith.constant 0 : i32
    return %c0_i32, %c0_i32_0, %c0_i32_1 : i32, i32, i32
  }
  func.func @transform_12(%arg0: i32) -> (i32, i32, i32) {
    %c0_i32 = arith.constant 0 : i32
    %c0_i32_0 = arith.constant 0 : i32
    %c0_i32_1 = arith.constant 0 : i32
    %c0_i32_2 = arith.constant 0 : i32
    return %c0_i32, %c0_i32_0, %c0_i32_1 : i32, i32, i32
  }
  func.func @transform_14(%arg0: i32) -> (i32, i32) {
    %c0_i32 = arith.constant 0 : i32
    %c0_i32_0 = arith.constant 0 : i32
    %c0_i32_1 = arith.constant 0 : i32
    return %c0_i32, %c0_i32_0 : i32, i32
  }
  func.func @transform_15(%arg0: i32) -> (i32, i32) {
    %c0_i32 = arith.constant 0 : i32
    %c0_i32_0 = arith.constant 0 : i32
    %c0_i32_1 = arith.constant 0 : i32
    return %c0_i32, %c0_i32_0 : i32, i32
  }
}

</mosaic_0001>

<bundles_post_ra>
// kernel: attn_decoder_forward.3
= control target key start
LH: loop header
LB: loop body
LE: loop exit
PB: predicated region body
PF: predicated region fallthrough
CT: control target
= control target key end

     0   :  { %v132_v0 = vmov 0.0   ;;  %vm133_vm0 = vmmov 0   ;;  %vm41_vm1 = vcmask 261120   ;;  %vm86_vm2 = vcmask 1043456   ;;  %s177_s1 = inlined_call_operand.vmem [shape: bf16[32,128], index: 1, kind: input, shape index: {}]   ;;  %s178_s0 = inlined_call_operand.vmem [shape: bf16[4,32], index: 0, kind: input, shape index: {}]   ;;  %s179_s2 = inlined_call_operand.vmem [shape: f32[1,128], index: 2, kind: input, shape index: {}]   ;;  %s180_s3 = inlined_call_operand.vmem [shape: f32[4,128], index: 3, kind: output, shape index: {0}]   ;;  %s181_s4 = inlined_call_operand.vmem [shape: f32[1,4,1], index: 4, kind: output, shape index: {1}]  }
   0x1   :  { %116 = vmatprep.subr.bf16.mxu0 %v132_v0  ;;  %v126_v1 = vld [vmem:[%s177_s1 + $0x8] sm:$0xff]   ;;  %120 = vmatprep.mubr.msk.bf16.mxu0 %vm133_vm0, %v132_v0  ;;  %v127_v2 = vld [vmem:[%s177_s1] sm:$0xff]   ;;  %vm99_vm3 = vcmask 3072  }
   0x2   :  { %117 = vmatpush3.bf16.msra.mxu0 %v126_v1  ;;  %v17_v3 = vld [vmem:[%s178_s0] sm:$0x3] }
   0x3   :  { %118 = vmatprep.subr.bf16.mxu0 %v132_v0  ;;  %v109_v4 = vld [vmem:[%s179_s2] ss:$0 sm:$0xff] }
   0x6   :  { %119 = vmatpush3.bf16.msra.mxu0 %v127_v2 }
   0x9   :  { %121 = vmatmul.mubr.msk.bf16.vlgmr.msra.gmra.mxu0 %vm41_vm1, %v17_v3 }
  0xc9   :  { %v79_v5 = vpop.f32.mrf.mxu0 }
  0xca   :  { %v80_v6 = vadd.f32 %v109_v4, %v79_v5 }
  0xcb   :  { %v122_v7 = vpop.f32.mrf.mxu0 }
  0xcc   :  { %85 = vst [vmem:[%s180_s3] sm:$0xf] %v80_v6  ;;  %v87_v8 = vsel %vm86_vm2, %v80_v6, -inf }
  0xcd   :  { %88 = vmax.xlane.f32.xlu0 %v87_v8  ;;  %v82_v9 = vpop.f32.mrf.mxu0 }
  0xcf   :  { %v123_v10 = vpop.f32.mrf.mxu0 }
 0x156   :  { %v89_v11 = vpop.xlane.xlu0 %88 }
 0x157   :  { %v90_v12 = vsub.f32 %v80_v6, %v89_v11 }
 0x159   :  { %v91_v13 = vmul.f32 1.442695, %v90_v12 }
 0x15b   :  { %128 = vpow2.f32 %v91_v13 }
 0x168   :  { %v129_v14 = vpop.eup %128 }
 0x169   :  { %v93_v15 = vsel %vm86_vm2, %v129_v14, 0.0 }
 0x16a   :  { %94 = vadd.xlane.f32.xlu0 %v93_v15 }
 0x1f3   :  { %v95_v16 = vpop.xlane.xlu0 %94 }
 0x1f4   :  { %130 = vlog2.f32 %v95_v16 }
 0x201   :  { %v131_v17 = vpop.eup %130 }
 0x202   :  { %v97_v18 = vmul.f32 0.6931472, %v131_v17 }
 0x204   :  { %v98_v19 = vadd.f32 %v97_v18, %v89_v11 }
 0x206   :  { %100 = vst.msk [vmem:[%s181_s4] sm:$0xf] %vm99_vm3, %v98_v19 }

// kernel: attn_decoder_forward.2
= control target key start
LH: loop header
LB: loop body
LE: loop exit
PB: predicated region body
PF: predicated region fallthrough
CT: control target
= control target key end

     0   :  { %21 = vsyncpa [#allocation7], 0  ;;  %s2349_s0 = inlined_call_operand.vmem [shape: s32[4], index: 0, kind: input, shape index: {}]   ;;  %s2350_s1 = inlined_call_operand.vmem [shape: f32[4,32], index: 1, kind: input, shape index: {}, may-alias: {1,14}]   ;;  %s2351_s2 = inlined_call_operand.hbm [shape: f32[4,8,32], index: 2, kind: input, shape index: {}]   ;;  %s2352_s3 = inlined_call_operand.hbm [shape: f32[64,8], index: 3, kind: input, shape index: {}]   ;;  %s2353_s4 = inlined_call_operand.vmem [shape: f32[1,8], index: 4, kind: input, shape index: {}]   ;;  %s2354_s5 = inlined_call_operand.hbm [shape: f32[64,32], index: 5, kind: input, shape index: {}]   ;;  %s2355_s6 = inlined_call_operand.vmem [shape: f32[1,32], index: 6, kind: input, shape index: {}]   ;;  %s2356_s7 = inlined_call_operand.vmem [shape: f32[1,32], index: 7, kind: input, shape index: {}]   ;;  %s2357_s8 = inlined_call_operand.vmem [shape: f32[1,32], index: 8, kind: input, shape index: {}]   ;;  %s2358_s9 = inlined_call_operand.hbm [shape: f32[3,32,32], index: 9, kind: input, shape index: {}]   ;;  %s2359_s10 = inlined_call_operand.hbm [shape: f32[3,32,32], index: 10, kind: input, shape index: {}]   ;;  %s2360_s11 = inlined_call_operand.vmem [shape: f32[3,1,32], index: 11, kind: input, shape index: {}]   ;;  %s2361_s12 = inlined_call_operand.vmem [shape: f32[3,1,32], index: 12, kind: input, shape index: {}]   ;;  %s2362_s13 = inlined_call_operand.vmem [shape: f32[16,32], index: 13, kind: input, shape index: {}]   ;;  %s2363_s14 = inlined_call_operand.vmem [shape: f32[4,32], index: 14, kind: output, shape index: {0}, may-alias: {1,14}]   ;;  %s2364_s15 = inlined_call_operand.hbm [shape: f32[4,8], index: 15, kind: output, shape index: {1}]  }
   0x1   :  { %22 = vsyncpa [#allocation5], 0 }
   0x2   :  { %23 = vsyncpa [#allocation10], 0 }
   0x3   :  { %24 = vsyncpa [#allocation13], 0 }
   0x4   :  { %25 = vsyncpa [#allocation6], 0  ;;  %s2061_s18 = smov [#allocation9]   ;;  %s2062_s20 = smov [#allocation12]  }
   0x5   :  { %s55_s19 = sshll.u32 %s2061_s18, 4  ;;  %s87_s21 = sshll.u32 %s2062_s20, 4  ;;  %s56_s19 = int_to_ptr.vmem [resolvable:$true] %s55_s19  ;;  %s88_s21 = int_to_ptr.vmem [resolvable:$true] %s87_s21 }
   0x6   :  { %s1919_s22 = scalar_lea.vmem %s56_s19, 1024  ;;  %p1924_p1 = scmp.lt.s32.totalorder %s56_s19, %s56_s19 }
   0x7   :  { %p1920_p0 = scmp.ne.s32.totalorder %s56_s19, %s1919_s22  ;;  %p1925_p2 = scmp.lt.s32.totalorder %s1919_s22, %s1919_s22 }
   0x9   :  { %p1926_p3 = por %p1925_p2, %p1924_p1 }
   0xb   :  { %p1927_p4 = pnand %p1926_p3, %p1920_p0 }
   0xd   :  { %1930 = shalt.err (!%p1927_p4)
}
   0xe   :  { %s2063_s23 = smov 128   ;;  %s2064_s24 = smov 8  }
   0xf   :  { %61 = dma.hbm_to_vmem [thread:$0]  %s2352_s3, 1024, %s56_s19, [#allocation10], %s2063_s23, %s2063_s23, %s2064_s24  }
  0x10   :  { %s1939_s27 = scalar_lea.vmem %s88_s21, 1536  ;;  %p1944_p6 = scmp.lt.s32.totalorder %s88_s21, %s88_s21 }
  0x11   :  { %p1940_p5 = scmp.ne.s32.totalorder %s88_s21, %s1939_s27  ;;  %p1945_p7 = scmp.lt.s32.totalorder %s1939_s27, %s1939_s27 }
  0x13   :  { %p1946_p8 = por %p1945_p7, %p1944_p6 }
  0x15   :  { %p1947_p9 = pnand %p1946_p8, %p1940_p5 }
  0x17   :  { %1950 = shalt.err (!%p1947_p9)
}
  0x18   :  { %93 = dma.hbm_to_vmem [thread:$0]  %s2358_s9, 1536, %s88_s21, [#allocation13], %s2063_s23, %s2063_s23, %s2064_s24  }
  0x19   :  { %s32_s17 = sshll.u32 %s2349_s0, 4  ;;  %s33_s17 = int_to_ptr.vmem [resolvable:$true] %s32_s17 }
  0x1a   :  { %s1951_s3 = scalar_lea.vmem %s33_s17, 16  ;;  %p1956_p11 = scmp.lt.s32.totalorder %s33_s17, %s33_s17 }
  0x1b   :  { %p1952_p10 = scmp.ne.s32.totalorder %s33_s17, %s1951_s3  ;;  %p1957_p12 = scmp.lt.s32.totalorder %s1951_s3, %s1951_s3 }
  0x1d   :  { %p1958_p13 = por %p1957_p12, %p1956_p11 }
  0x1f   :  { %p1959_p0 = pnand %p1958_p13, %p1952_p10 }
  0x21   :  { %1962 = shalt.err (!%p1959_p0)
}
  0x22   :  { %s2065_s18 = smov [#allocation4]   ;;  %s2066_s19 = smov [#allocation8]  }
  0x23   :  { %35 = dma.vmem_to_smem %s33_s17, 16, %s2065_s18, [#allocation7]  }
  0x24   :  { %s43_s20 = sshll.u32 %s2066_s19, 4  ;;  %s2067_s22 = smov [#allocation11]   ;;  %s44_s20 = int_to_ptr.vmem [resolvable:$true] %s43_s20 }
  0x25   :  { %s69_s25 = sshll.u32 %s2067_s22, 4  ;;  %s1971_s9 = scalar_lea.vmem %s44_s20, 512  ;;  %s70_s25 = int_to_ptr.vmem [resolvable:$true] %s69_s25 }
  0x26   :  { %p1972_p1 = scmp.ne.s32.totalorder %s44_s20, %s1971_s9  ;;  %p1976_p2 = scmp.lt.s32.totalorder %s44_s20, %s44_s20 }
  0x27   :  { %p1977_p3 = scmp.lt.s32.totalorder %s1971_s9, %s1971_s9 }
  0x29   :  { %p1978_p4 = por %p1977_p3, %p1976_p2 }
  0x2b   :  { %p1979_p5 = pnand %p1978_p4, %p1972_p1 }
  0x2d   :  { %1982 = shalt.err (!%p1979_p5)
}
  0x2e   :  { %49 = dma.hbm_to_vmem [thread:$0]  %s2351_s2, 512, %s44_s20, [#allocation5], %s2063_s23, %s2063_s23, %s2064_s24  }
  0x2f   :  { %s1991_s26 = scalar_lea.vmem %s70_s25, 1024  ;;  %p1996_p7 = scmp.lt.s32.totalorder %s70_s25, %s70_s25 }
  0x30   :  { %p1992_p6 = scmp.ne.s32.totalorder %s70_s25, %s1991_s26  ;;  %p1997_p8 = scmp.lt.s32.totalorder %s1991_s26, %s1991_s26 }
  0x32   :  { %p1998_p9 = por %p1997_p8, %p1996_p7 }
  0x34   :  { %p1999_p10 = pnand %p1998_p9, %p1992_p6 }
  0x36   :  { %2002 = shalt.err (!%p1999_p10)
}
  0x37   :  { %75 = dma.hbm_to_vmem [thread:$0]  %s2354_s5, 1024, %s70_s25, [#allocation10], %s2063_s23, %s2063_s23, %s2064_s24  }
  0x38   :  { %s2068_s29 = smov [#allocation14]  }
  0x39   :  { %s99_s30 = sshll.u32 %s2068_s29, 4  ;;  %s100_s30 = int_to_ptr.vmem [resolvable:$true] %s99_s30 }
  0x3a   :  { %s2011_s16 = scalar_lea.vmem %s100_s30, 1536  ;;  %p2016_p12 = scmp.lt.s32.totalorder %s100_s30, %s100_s30 }
  0x3b   :  { %p2012_p11 = scmp.ne.s32.totalorder %s100_s30, %s2011_s16  ;;  %p2017_p13 = scmp.lt.s32.totalorder %s2011_s16, %s2011_s16 }
  0x3d   :  { %p2018_p0 = por %p2017_p13, %p2016_p12 }
  0x3f   :  { %p2019_p1 = pnand %p2018_p0, %p2012_p11 }
  0x41   :  { %2022 = shalt.err (!%p2019_p1)
}
  0x42   :  { %105 = dma.hbm_to_vmem [thread:$0]  %s2359_s10, 1536, %s100_s30, [#allocation13], %s2063_s23, %s2063_s23, %s2064_s24  }
  0x43   :  { %2043 = dma.done.wait [#allocation7], 16  }
  0x44   :  { %2044 = vsyncadd [#allocation7], 4294967280 }
  0x45   :  { %2045 = dma.done.wait [#allocation5], 512  }
  0x46   :  { %2046 = vsyncadd [#allocation5], 4294966784 }
  0x47   :  { %2047 = dma.done.wait [#allocation10], 2048  }
  0x48   :  { %2048 = vsyncadd [#allocation10], 4294965248 }
  0x49   :  { %2049 = dma.done.wait [#allocation13], 3072  }
  0x4a   :  { %2050 = vsyncadd [#allocation13], 4294964224 }
  0x4b   :  { %128 = sfence }
  0x4c   :  { %s129_s5 = sld [smem:[#allocation4]] }
  0x52   :  { %s130_s19 = scalar_lea.vmem %s2362_s13, %s129_s5 }
  0x53   :  { %v149_v0 = vld [vmem:[%s130_s19] sm:$0x1] }
  0x54   :  { %150 = vst [vmem:[#allocation2] sm:$0x1] %v149_v0 }
  0x55   :  { %176 = vsyncadd [#allocation3], 16  ;;  %s1658_s20 = sld [smem:[#allocation4 + $0x1]] }
  0x5b   :  { %s178_s23 = scalar_lea.vmem %s2362_s13, %s1658_s20 }
  0x5c   :  { %v199_v1 = vld [vmem:[%s178_s23] sm:$0x1] }
  0x5d   :  { %200 = vst [vmem:[#allocation2 + $0x1] sm:$0x1] %v199_v1 }
  0x5e   :  { %226 = vsyncadd [#allocation3 + $0x1], 16  ;;  %s1659_s24 = sld [smem:[#allocation4 + $0x2]] }
  0x64   :  { %s228_s0 = scalar_lea.vmem %s2362_s13, %s1659_s24 }
  0x65   :  { %v249_v2 = vld [vmem:[%s228_s0] sm:$0x1] }
  0x66   :  { %250 = vst [vmem:[#allocation2 + $0x2] sm:$0x1] %v249_v2 }
  0x67   :  { %276 = vsyncadd [#allocation3 + $0x2], 16  ;;  %s1660_s21 = sld [smem:[#allocation4 + $0x3]] }
  0x6d   :  { %s278_s28 = scalar_lea.vmem %s2362_s13, %s1660_s21 }
  0x6e   :  { %v299_v3 = vld [vmem:[%s278_s28] sm:$0x1] }
  0x6f   :  { %300 = vst [vmem:[#allocation2 + $0x3] sm:$0x1] %v299_v3 }
  0x70   :  { %326 = vsyncadd [#allocation3 + $0x3], 16  ;;  %v331_v4 = vld [vmem:[#allocation9 + $0x38] sm:$0xff]  ;;  %v2069_v6 = vmov 0.0   ;;  %v330_v7 = vld [vmem:[#allocation9 + $0x30] sm:$0xff]  ;;  %vm332_vm0 = vcmask 261120  }
  0x71   :  { %v409_v5 = vld [vmem:[#allocation14 + $0x18] sm:$0xff]  ;;  %1753 = vmatprep.subr.mxu0 %v2069_v6  ;;  %1764 = vmatprep.subr.mxu1 %v2069_v6  ;;  %v408_v8 = vld [vmem:[#allocation14 + $0x10] sm:$0xff]  ;;  %v329_v9 = vld [vmem:[#allocation9 + $0x28] sm:$0xff]  ;;  %vm2070_vm1 = vmmov 0  }
  0x72   :  { %1754 = vmatpush3.msra.mxu0 %v331_v4  ;;  %1765 = vmatpush3.msra.mxu1 %v409_v5  ;;  %v407_v10 = vld [vmem:[#allocation14 + $0x8] sm:$0xff]  ;;  %v328_v11 = vld [vmem:[#allocation9 + $0x20] sm:$0xff]  ;;  %v2209_v13 = vld [vmem:[%s2350_s1] sm:$0xf] }
  0x73   :  { %1755 = vmatprep.subr.mxu0 %v2069_v6  ;;  %1766 = vmatprep.subr.mxu1 %v2069_v6  ;;  %v406_v12 = vld [vmem:[#allocation14] sm:$0xff]  ;;  %v491_v14 = vld [vmem:[#allocation14 + $0x38] sm:$0xff]  ;;  %v490_v16 = vld [vmem:[#allocation14 + $0x30] sm:$0xff] }
  0x74   :  { %1756 = vmatpush3.msra.mxu0 %v330_v7  ;;  %1767 = vmatpush3.msra.mxu1 %v408_v8  ;;  %v574_v15 = vld [vmem:[#allocation14 + $0x58] sm:$0xff]  ;;  %v573_v17 = vld [vmem:[#allocation14 + $0x50] sm:$0xff]  ;;  %v489_v18 = vld [vmem:[#allocation14 + $0x28] sm:$0xff] }
  0x75   :  { %1757 = vmatprep.subr.mxu0 %v2069_v6  ;;  %1768 = vmatprep.subr.mxu1 %v2069_v6  ;;  %v572_v19 = vld [vmem:[#allocation14 + $0x48] sm:$0xff]  ;;  %v488_v20 = vld [vmem:[#allocation14 + $0x20] sm:$0xff]  ;;  %v1662_v22 = vld [vmem:[%s2361_s12] ss:$0 sm:$0xff] }
  0x76   :  { %1758 = vmatpush3.msra.mxu0 %v329_v9  ;;  %1769 = vmatpush3.msra.mxu1 %v407_v10  ;;  %v571_v21 = vld [vmem:[#allocation14 + $0x40] sm:$0xff]  ;;  %v1665_v28 = vld [vmem:[%s2361_s12 + $0x1] ss:$0 sm:$0xff]  ;;  %v1668_v29 = vld [vmem:[%s2361_s12 + $0x2] ss:$0 sm:$0xff] }
  0x77   :  { %1759 = vmatprep.subr.mxu0 %v2069_v6  ;;  %1770 = vmatprep.subr.mxu1 %v2069_v6 }
  0x78   :  { %1760 = vmatpush3.msra.mxu0 %v328_v11  ;;  %1761 = vmatprep.mubr.msk.f32.mxu0 %vm2070_vm1, %v2069_v6 }
  0x79   :  { %1771 = vmatpush3.msra.mxu1 %v406_v12  ;;  %1772 = vmatprep.mubr.msk.f32.mxu1 %vm2070_vm1, %v2069_v6 }
  0x7a   :  { %1762 = vmatmul.mubr.msk.f32.vlgmr.msra.gmra.mxu0 %vm332_vm0, %v2209_v13  ;;  %1773 = vmatmul.mubr.msk.f32.vlgmr.msra.gmra.mxu1 %vm332_vm0, %v2209_v13 }
  0x7b   :  { %1775 = vmatprep.subr.mxu0 %v2069_v6  ;;  %1786 = vmatprep.subr.mxu1 %v2069_v6 }
  0x7c   :  { %1776 = vmatpush3.msra.mxu0 %v491_v14  ;;  %1787 = vmatpush3.msra.mxu1 %v574_v15 }
  0x7d   :  { %1777 = vmatprep.subr.mxu0 %v2069_v6  ;;  %1788 = vmatprep.subr.mxu1 %v2069_v6 }
  0x7e   :  { %1778 = vmatpush3.msra.mxu0 %v490_v16  ;;  %1789 = vmatpush3.msra.mxu1 %v573_v17 }
  0x7f   :  { %1779 = vmatprep.subr.mxu0 %v2069_v6  ;;  %1790 = vmatprep.subr.mxu1 %v2069_v6 }
  0x80   :  { %1780 = vmatpush3.msra.mxu0 %v489_v18  ;;  %1791 = vmatpush3.msra.mxu1 %v572_v19 }
  0x81   :  { %1781 = vmatprep.subr.mxu0 %v2069_v6  ;;  %1792 = vmatprep.subr.mxu1 %v2069_v6 }
  0x82   :  { %1782 = vmatpush3.msra.mxu0 %v488_v20  ;;  %1783 = vmatprep.mubr.msk.f32.mxu0 %vm2070_vm1, %v2069_v6 }
  0x83   :  { %1793 = vmatpush3.msra.mxu1 %v571_v21  ;;  %1794 = vmatprep.mubr.msk.f32.mxu1 %vm2070_vm1, %v2069_v6 }
  0x84   :  { %1784 = vmatmul.mubr.msk.f32.vlgmr.msra.gmra.mxu0 %vm332_vm0, %v2209_v13  ;;  %1795 = vmatmul.mubr.msk.f32.vlgmr.msra.gmra.mxu1 %vm332_vm0, %v2209_v13 }
 0x13a   :  { %v402_v23 = vpop.f32.mrf.mxu0  ;;  %v483_v24 = vpop.f32.mrf.mxu1 }
 0x13b   :  { %v2238_v25 = vadd.f32 %v1662_v22, %v483_v24 }
 0x13c   :  { %v1763_v26 = vpop.f32.mrf.mxu0  ;;  %v1774_v27 = vpop.f32.mrf.mxu1 }
 0x144   :  { %v566_v30 = vpop.f32.mrf.mxu0  ;;  %v649_v31 = vpop.f32.mrf.mxu1 }
 0x145   :  { %v2246_v32 = vadd.f32 %v1665_v28, %v566_v30  ;;  %v2248_v33 = vadd.f32 %v1668_v29, %v649_v31 }
 0x146   :  { %v1785_v34 = vpop.f32.mrf.mxu0  ;;  %v1796_v35 = vpop.f32.mrf.mxu1 }
 0x147   :  { %2051 = dma.done.wait [#allocation3], 16 }
 0x148   :  { %2052 = vsyncadd [#allocation3], 4294967280 }
 0x149   :  { %2053 = dma.done.wait [#allocation3 + $0x1], 16 }
 0x14a   :  { %2054 = vsyncadd [#allocation3 + $0x1], 4294967280 }
 0x14b   :  { %2055 = dma.done.wait [#allocation3 + $0x2], 16 }
 0x14c   :  { %2056 = vsyncadd [#allocation3 + $0x2], 4294967280 }
 0x14d   :  { %2057 = dma.done.wait [#allocation3 + $0x3], 16 }
 0x14e   :  { %2058 = vsyncadd [#allocation3 + $0x3], 4294967280  ;;  %1797 = vmatprep.subr.mxu0 %v2069_v6  ;;  %1805 = vmatprep.mubr.msk.f32.mxu0 %vm2070_vm1, %v2069_v6  ;;  %v666_v36 = vld [vmem:[#allocation9 + $0x18] sm:$0xff]  ;;  %v665_v37 = vld [vmem:[#allocation9 + $0x10] sm:$0xff]  ;;  %vm748_vm2 = vcmask 60416   ;;  %v765_v56 = vlaneseq  ;;  %vm790_vm3 = vcmask 64512  }
 0x14f   :  { %1808 = vmatprep.subr.mxu1 %v2069_v6  ;;  %1810 = vmatprep.mubr.msk.f32.mxu1 %vm2070_vm1, %v2069_v6  ;;  %v664_v38 = vld [vmem:[#allocation9 + $0x8] sm:$0xff]  ;;  %v663_v39 = vld [vmem:[#allocation9] sm:$0xff]  ;;  %v2258_v40 = vld [vmem:[#allocation2] sm:$0xf]  ;;  %v2071_v54 = vmov 1966171168  }
 0x150   :  { %1798 = vmatpush3.msra.mxu0 %v666_v36  ;;  %v1671_v42 = vld [vmem:[%s2353_s4] ss:$0 sm:$0xff]  ;;  %v786_v52 = vld [vmem:[#allocation8] sm:$0xff]  ;;  %v763_v55 = vunpack.c.l.s4 %v2071_v54  ;;  %v766_v58 = vshrl.u32 %v765_v56, 7  ;;  %v787_v1 = vld [vmem:[#allocation8 + $0x8] sm:$0xff]  ;;  %vm1092_vm4 = vcmask 1041409  }
 0x151   :  { %1799 = vmatprep.subr.mxu0 %v2069_v6  ;;  %1809 = vmatpush3.msra.mxu1 %v786_v52  ;;  %v788_v3 = vld [vmem:[#allocation8 + $0x10] sm:$0xff]  ;;  %v789_v5 = vld [vmem:[#allocation8 + $0x18] sm:$0xff]  ;;  %v1080_v12 = vld [vmem:[#allocation11 + $0x8] sm:$0xff]  ;;  %vm1095_vm5 = vcmask 1042434   ;;  %vm1098_vm6 = vcmask 1043459   ;;  %vm1251_vm7 = vcmask 257024  }
 0x152   :  { %1800 = vmatpush3.msra.mxu0 %v665_v37  ;;  %1813 = vmatprep.subr.mxu1 %v2069_v6  ;;  %v764_v57 = vunpack.c.0.s8 %v763_v55  ;;  %v1082_v8 = vld [vmem:[#allocation11 + $0x18] sm:$0xff]  ;;  %v1081_v10 = vld [vmem:[#allocation11 + $0x10] sm:$0xff]  ;;  %v1084_v14 = vld [vmem:[#allocation11 + $0x28] sm:$0xff] }
 0x153   :  { %1801 = vmatprep.subr.mxu0 %v2069_v6  ;;  %v1086_v9 = vld [vmem:[#allocation11 + $0x38] sm:$0xff]  ;;  %v1085_v11 = vld [vmem:[#allocation11 + $0x30] sm:$0xff]  ;;  %v1079_v15 = vld [vmem:[#allocation11] sm:$0xff] }
 0x154   :  { %1802 = vmatpush3.msra.mxu0 %v664_v38  ;;  %v767_v59 = vsub.s32 %v764_v57, %v766_v58  ;;  %v1083_v16 = vld [vmem:[#allocation11 + $0x20] sm:$0xff]  ;;  %v1293_v36 = vld [vmem:[#allocation12 + $0x18] sm:$0xff]  ;;  %v1292_v38 = vld [vmem:[#allocation12 + $0x10] sm:$0xff] }
 0x155   :  { %1803 = vmatprep.subr.mxu0 %v2069_v6  ;;  %v1378_v37 = vld [vmem:[#allocation12 + $0x38] sm:$0xff] }
 0x156   :  { %1804 = vmatpush3.msra.mxu0 %v663_v39  ;;  %v1377_v39 = vld [vmem:[#allocation12 + $0x30] sm:$0xff] }
 0x157   :  { %1806 = vmatmul.mubr.msk.f32.vlgmr.msra.gmra.mxu0 %vm332_vm0, %v2258_v40  ;;  %1828 = vmatprep.subr.mxu0 %v2069_v6 }
 0x158   :  { %1836 = vmatprep.mubr.msk.f32.mxu0 %vm2070_vm1, %v2069_v6  ;;  %1829 = vmatpush3.msra.mxu0 %v1086_v9  ;;  %v1680_v9 = vld [vmem:[%s2357_s8] ss:$0 sm:$0xff] }
 0x159   :  { %1830 = vmatprep.subr.mxu0 %v2069_v6 }
 0x15a   :  { %1831 = vmatpush3.msra.mxu0 %v1085_v11 }
 0x15b   :  { %1832 = vmatprep.subr.mxu0 %v2069_v6 }
 0x15c   :  { %1833 = vmatpush3.msra.mxu0 %v1084_v14  ;;  %v1460_v14 = vld [vmem:[#allocation12 + $0x50] sm:$0xff] }
 0x15d   :  { %1834 = vmatprep.subr.mxu0 %v2069_v6 }
 0x15e   :  { %1835 = vmatpush3.msra.mxu0 %v1083_v16  ;;  %v1458_v16 = vld [vmem:[#allocation12 + $0x40] sm:$0xff] }
 0x15f   :  { %1850 = vmatprep.subr.mxu0 %v2069_v6 }
 0x217   :  { %v736_v41 = vpop.f32.mrf.mxu0 }
 0x218   :  { %v737_v43 = vadd.f32 %v736_v41, %v402_v23  ;;  %v1376_v41 = vld [vmem:[#allocation12 + $0x28] sm:$0xff] }
 0x219   :  { %v1807_v44 = vpop.f32.mrf.mxu0 }
 0x21a   :  { %v747_v45 = vadd.f32 %v1671_v42, %v737_v43  ;;  %v1290_v42 = vld [vmem:[#allocation12] sm:$0xff] }
 0x21b   :  { %v1375_v43 = vld [vmem:[#allocation12 + $0x20] sm:$0xff] }
 0x21c   :  { %v749_v46 = vsel %vm748_vm2, %v747_v45, -inf }
 0x21d   :  { %750 = vmax.xlane.f32.xlu0 %v749_v46 }
 0x2a6   :  { %v751_v47 = vpop.xlane.xlu0 %750 }
 0x2a7   :  { %v752_v48 = vsub.f32 %v747_v45, %v751_v47  ;;  %v1678_v45 = vld [vmem:[%s2355_s6] ss:$0 sm:$0xff] }
 0x2a9   :  { %v753_v49 = vmul.f32 1.442695, %v752_v48 }
 0x2ab   :  { %1895 = vpow2.f32 %v753_v49 }
 0x2b8   :  { %v1896_v50 = vpop.eup %1895 }
 0x2b9   :  { %v755_v51 = vsel %vm748_vm2, %v1896_v50, 0.0 }
 0x2ba   :  { %756 = vadd.xlane.f32.xlu0 %v755_v51 }
 0x343   :  { %v757_v53 = vpop.xlane.xlu0 %756 }
 0x344   :  { %1897 = vrcp.f32 %v757_v53 }
 0x351   :  { %v1898_v60 = vpop.eup %1897 }
 0x352   :  { %v759_v61 = vmul.f32 %v1898_v60, %v1896_v50 }
 0x354   :  { %v768_v62 = vrot.slane %v759_v61, %v767_v59  ;;  %760 = vst.msk [vmem:[#allocation15] sm:$0xf] %vm748_vm2, %v759_v61 }
 0x356   :  { %v769_v63 = vcombine.high %v768_v62, %v768_v62  ;;  %v776_v0 = vrot.slane %v768_v62, %v767_v59 }
 0x358   :  { %1811 = vmatmul.mubr.msk.f32.vlgmr.msra.gmra.mxu1 %vm790_vm3, %v776_v0  ;;  %v783_v2 = vrot.slane %v769_v63, %v767_v59  ;;  %v784_v4 = vcombine.high %v776_v0, %v776_v0 }
 0x359   :  { %1814 = vmatpush3.msra.mxu1 %v787_v1  ;;  %1815 = vmatprep.mubr.msk.f32.mxu1 %vm2070_vm1, %v2069_v6 }
 0x35a   :  { %1818 = vmatprep.subr.mxu1 %v2069_v6  ;;  %v785_v7 = vcombine.high %v783_v2, %v783_v2 }
 0x35c   :  { %1816 = vmatmul.mubr.msk.f32.vlgmr.msra.gmra.mxu1 %vm790_vm3, %v783_v2 }
 0x35d   :  { %1819 = vmatpush3.msra.mxu1 %v788_v3  ;;  %1820 = vmatprep.mubr.msk.f32.mxu1 %vm2070_vm1, %v2069_v6 }
 0x35e   :  { %1823 = vmatprep.subr.mxu1 %v2069_v6 }
 0x360   :  { %1821 = vmatmul.mubr.msk.f32.vlgmr.msra.gmra.mxu1 %vm790_vm3, %v784_v4 }
 0x361   :  { %1824 = vmatpush3.msra.mxu1 %v789_v5  ;;  %1825 = vmatprep.mubr.msk.f32.mxu1 %vm2070_vm1, %v2069_v6  ;;  %v1679_v5 = vld [vmem:[%s2356_s7] ss:$0 sm:$0xff]  ;;  %s2072_s7 = smov [#allocation15]  }
 0x362   :  { %1839 = vmatprep.subr.mxu1 %v2069_v6  ;;  %s1570_s8 = sshll.u32 %s2072_s7, 4  ;;  %s1571_s8 = int_to_ptr.vmem [resolvable:$true] %s1570_s8 }
 0x363   :  { %s2023_s10 = scalar_lea.vmem %s1571_s8, 64  ;;  %p2028_p3 = scmp.lt.s32.totalorder %s1571_s8, %s1571_s8 }
 0x364   :  { %1826 = vmatmul.mubr.msk.f32.vlgmr.msra.gmra.mxu1 %vm790_vm3, %v785_v7  ;;  %p2024_p2 = scmp.ne.s32.totalorder %s1571_s8, %s2023_s10  ;;  %p2029_p4 = scmp.lt.s32.totalorder %s2023_s10, %s2023_s10 }
 0x365   :  { %1847 = vmatprep.mubr.msk.f32.mxu1 %vm2070_vm1, %v2069_v6  ;;  %1840 = vmatpush3.msra.mxu1 %v1082_v8 }
 0x366   :  { %1841 = vmatprep.subr.mxu1 %v2069_v6  ;;  %p2030_p5 = por %p2029_p4, %p2028_p3 }
 0x367   :  { %1842 = vmatpush3.msra.mxu1 %v1081_v10 }
 0x368   :  { %1843 = vmatprep.subr.mxu1 %v2069_v6  ;;  %p2031_p6 = pnand %p2030_p5, %p2024_p2 }
 0x369   :  { %1844 = vmatpush3.msra.mxu1 %v1080_v12  ;;  %v1461_v12 = vld [vmem:[#allocation12 + $0x58] sm:$0xff] }
 0x36a   :  { %1845 = vmatprep.subr.mxu1 %v2069_v6 }
 0x36b   :  { %1846 = vmatpush3.msra.mxu1 %v1079_v15  ;;  %v1459_v15 = vld [vmem:[#allocation12 + $0x48] sm:$0xff] }
 0x36c   :  { %1848 = vmatmul.mubr.msk.f32.vlgmr.msra.gmra.mxu1 %vm332_vm0, %v2258_v40  ;;  %1861 = vmatprep.subr.mxu1 %v2069_v6  ;;  %v1291_v40 = vld [vmem:[#allocation12 + $0x8] sm:$0xff] }
 0x36d   :  { %1869 = vmatprep.mubr.msk.f32.mxu1 %vm2070_vm1, %v2069_v6  ;;  %1862 = vmatpush3.msra.mxu1 %v1378_v37 }
 0x36e   :  { %1863 = vmatprep.subr.mxu1 %v2069_v6 }
 0x36f   :  { %1864 = vmatpush3.msra.mxu1 %v1377_v39 }
 0x370   :  { %1865 = vmatprep.subr.mxu1 %v2069_v6 }
 0x371   :  { %1866 = vmatpush3.msra.mxu1 %v1376_v41 }
 0x372   :  { %1867 = vmatprep.subr.mxu1 %v2069_v6 }
 0x373   :  { %1868 = vmatpush3.msra.mxu1 %v1375_v43 }
 0x418   :  { %v859_v17 = vpop.f32.mrf.mxu1 }
 0x41a   :  { %v1812_v18 = vpop.f32.mrf.mxu1 }
 0x41c   :  { %v931_v19 = vpop.f32.mrf.mxu1 }
 0x41d   :  { %v1091_v22 = vrot.slane %v931_v19, 7 }
 0x41e   :  { %v1817_v20 = vpop.f32.mrf.mxu1 }
 0x41f   :  { %v1093_v27 = vsel %vm1092_vm4, %v1091_v22, %v859_v17 }
 0x420   :  { %v1003_v21 = vpop.f32.mrf.mxu1 }
 0x421   :  { %v1094_v23 = vrot.slane %v1003_v21, 6 }
 0x422   :  { %v1822_v24 = vpop.f32.mrf.mxu1 }
 0x423   :  { %v1096_v29 = vsel %vm1095_vm5, %v1094_v23, %v1093_v27 }
 0x424   :  { %v1075_v26 = vpop.f32.mrf.mxu1 }
 0x425   :  { %v1097_v28 = vrot.slane %v1075_v26, 5 }
 0x426   :  { %v1827_v30 = vpop.f32.mrf.mxu1 }
 0x427   :  { %v1099_v31 = vsel %vm1098_vm6, %v1097_v28, %v1096_v29 }
 0x428   :  { %1837 = vmatmul.mubr.msk.f32.vlgmr.msra.gmra.mxu0 %vm332_vm0, %v1099_v31 }
 0x429   :  { %1858 = vmatprep.mubr.msk.f32.mxu0 %vm2070_vm1, %v2069_v6  ;;  %1851 = vmatpush3.msra.mxu0 %v1293_v36 }
 0x42a   :  { %1852 = vmatprep.subr.mxu0 %v2069_v6 }
 0x42b   :  { %1853 = vmatpush3.msra.mxu0 %v1292_v38 }
 0x42c   :  { %v1238_v34 = vpop.f32.mrf.mxu1  ;;  %1854 = vmatprep.subr.mxu0 %v2069_v6 }
 0x42d   :  { %1855 = vmatpush3.msra.mxu0 %v1291_v40 }
 0x42e   :  { %v1849_v35 = vpop.f32.mrf.mxu1  ;;  %1856 = vmatprep.subr.mxu0 %v2069_v6 }
 0x42f   :  { %1857 = vmatpush3.msra.mxu0 %v1290_v42 }
 0x430   :  { %1872 = vmatprep.subr.mxu0 %v2069_v6 }
 0x4e8   :  { %v1168_v44 = vpop.f32.mrf.mxu0 }
 0x4e9   :  { %v1239_v46 = vadd.f32 %v1238_v34, %v1168_v44 }
 0x4ea   :  { %v1838_v47 = vpop.f32.mrf.mxu0 }
 0x4eb   :  { %v1249_v48 = vadd.f32 %v1678_v45, %v1239_v46 }
 0x4ed   :  { %v1250_v49 = vmax.f32 %v1249_v48, 0.0 }
 0x4ef   :  { %v1252_v50 = vsel %vm1251_vm7, %v1250_v49, 0.0 }
 0x4f0   :  { %v1253_v51 = vrot.slane %v1252_v50, 4 }
 0x4f2   :  { %v1254_v52 = vadd.f32 %v1253_v51, %v1252_v50 }
 0x4f4   :  { %v1255_v53 = vrot.slane %v1254_v52, 2 }
 0x4f6   :  { %v1256_v54 = vadd.f32 %v1255_v53, %v1254_v52 }
 0x4f8   :  { %v1257_v55 = vrot.slane %v1256_v54, 1 }
 0x4fa   :  { %v1258_v56 = vadd.f32 %v1257_v55, %v1256_v54 }
 0x4fc   :  { %v1260_v57 = vmul.f32 0.25, %v1258_v56 }
 0x4fe   :  { %v1261_v58 = vsub.f32 %v1250_v49, %v1260_v57 }
 0x500   :  { %v1262_v59 = vmul.f32 %v1261_v58, %v1261_v58  ;;  %v1278_v7 = vmul.f32 %v1679_v5, %v1261_v58 }
 0x502   :  { %v1263_v60 = vsel %vm1251_vm7, %v1262_v59, 0.0 }
 0x503   :  { %v1264_v61 = vrot.slane %v1263_v60, 4 }
 0x505   :  { %v1265_v62 = vadd.f32 %v1264_v61, %v1263_v60 }
 0x507   :  { %v1266_v63 = vrot.slane %v1265_v62, 2 }
 0x509   :  { %v1267_v0 = vadd.f32 %v1266_v63, %v1265_v62 }
 0x50b   :  { %v1268_v1 = vrot.slane %v1267_v0, 1 }
 0x50d   :  { %v1269_v2 = vadd.f32 %v1268_v1, %v1267_v0 }
 0x50f   :  { %v1270_v3 = vmul.f32 0.25, %v1269_v2 }
 0x511   :  { %v1279_v4 = vadd.f32 1e-05, %v1270_v3 }
 0x513   :  { %1899 = vrsqrt.f32 %v1279_v4 }
 0x520   :  { %v1900_v8 = vpop.eup %1899 }
 0x521   :  { %v1281_v10 = vmul.f32 %v1900_v8, %v1278_v7 }
 0x523   :  { %v1289_v11 = vadd.f32 %v1680_v9, %v1281_v10 }
 0x525   :  { %1859 = vmatmul.mubr.msk.f32.vlgmr.msra.gmra.mxu0 %vm332_vm0, %v1289_v11  ;;  %1870 = vmatmul.mubr.msk.f32.vlgmr.msra.gmra.mxu1 %vm332_vm0, %v1289_v11 }
 0x526   :  { %1873 = vmatpush3.msra.mxu0 %v1461_v12  ;;  %1880 = vmatprep.mubr.msk.f32.mxu0 %vm2070_vm1, %v2069_v6 }
 0x527   :  { %1874 = vmatprep.subr.mxu0 %v2069_v6 }
 0x528   :  { %1875 = vmatpush3.msra.mxu0 %v1460_v14 }
 0x529   :  { %1876 = vmatprep.subr.mxu0 %v2069_v6 }
 0x52a   :  { %1877 = vmatpush3.msra.mxu0 %v1459_v15 }
 0x52b   :  { %1878 = vmatprep.subr.mxu0 %v2069_v6 }
 0x52c   :  { %1879 = vmatpush3.msra.mxu0 %v1458_v16 }
 0x52d   :  { %1881 = vmatmul.mubr.msk.f32.vlgmr.msra.gmra.mxu0 %vm332_vm0, %v1289_v11 }
 0x52e   :  { %2034 = shalt.err (!%p2031_p6)
}
 0x52f   :  { %1573 = dma.vmem_to_hbm [thread:$0]  %s1571_s8, 64, %s2364_s15, [#allocation6]   ;;  %v1681_v6 = vld [vmem:[%s2360_s11] ss:$0 sm:$0xff]  ;;  %v1684_v20 = vld [vmem:[%s2360_s11 + $0x1] ss:$0 sm:$0xff] }
 0x530   :  { %v1687_v37 = vld [vmem:[%s2360_s11 + $0x2] ss:$0 sm:$0xff] }
 0x5e5   :  { %v1370_v17 = vpop.f32.mrf.mxu0  ;;  %v1453_v18 = vpop.f32.mrf.mxu1 }
 0x5e6   :  { %v1371_v19 = vadd.f32 %v1681_v6, %v1370_v17  ;;  %v1454_v26 = vadd.f32 %v1684_v20, %v1453_v18 }
 0x5e7   :  { %v1860_v21 = vpop.f32.mrf.mxu0  ;;  %v1871_v22 = vpop.f32.mrf.mxu1 }
 0x5e8   :  { %v1540_v23 = vadd.f32 %v1371_v19, %v2238_v25  ;;  %v1547_v28 = vadd.f32 %v1454_v26, %v2246_v32 }
 0x5ea   :  { %v1689_v24 = vmul.f32 -1.442695, %v1540_v23  ;;  %v1690_v30 = vmul.f32 -1.442695, %v1547_v28 }
 0x5ec   :  { %1901 = vpow2.f32 %v1689_v24 }
 0x5ed   :  { %v1536_v27 = vpop.f32.mrf.mxu0  ;;  %1903 = vpow2.f32 %v1690_v30 }
 0x5ee   :  { %v1537_v25 = vadd.f32 %v1687_v37, %v1536_v27 }
 0x5ef   :  { %v1882_v29 = vpop.f32.mrf.mxu0 }
 0x5f9   :  { %v1902_v31 = vpop.eup %1901 }
 0x5fa   :  { %v1544_v34 = vadd.f32 1.0, %v1902_v31  ;;  %v1904_v35 = vpop.eup %1903 }
 0x5fb   :  { %v1551_v36 = vadd.f32 1.0, %v1904_v35 }
 0x5fc   :  { %1905 = vrcp.f32 %v1544_v34 }
 0x5fd   :  { %1907 = vrcp.f32 %v1551_v36 }
 0x609   :  { %v1906_v38 = vpop.eup %1905 }
 0x60a   :  { %v1554_v39 = vmul.f32 %v1906_v38, %v2248_v33  ;;  %v1908_v32 = vpop.eup %1907 }
 0x60b   :  { %v1557_v41 = vsub.f32 1.0, %v1908_v32  ;;  %v1559_v43 = vmul.f32 %v1908_v32, %v2209_v13 }
 0x60c   :  { %v1555_v40 = vadd.f32 %v1554_v39, %v1537_v25 }
 0x60e   :  { %1909 = vtanh.f32 %v1555_v40 }
 0x61b   :  { %v1910_v42 = vpop.eup %1909 }
 0x61c   :  { %v1558_v44 = vmul.f32 %v1910_v42, %v1557_v41 }
 0x61e   :  { %v1560_v45 = vadd.f32 %v1559_v43, %v1558_v44 }
 0x620   :  { %1561 = vst.msk [vmem:[%s2363_s14] sm:$0xf] %vm1251_vm7, %v1560_v45 }
 0x621   :  { %2059 = dma.done.wait [#allocation6], 64  }
 0x622   :  { %2060 = vsyncadd [#allocation6], 4294967232 }
 0x623   :  { %1579 = vsyncpa [#allocation5], 1 }
 0x624   :  { %1580 = vsyncpa [#allocation10], 1 }
 0x625   :  { %1581 = vsyncpa [#allocation13], 1 }
 0x626   :  { %1582 = vsyncpa [#allocation6], 1 }
 0x627   :  { %1583 = vsyncpa [#allocation7], 1 }
 0x628   :  { %1584 = vsyncmov [#allocation3] }
 0x62b   :  { %s1585_s11 = vpop.sfrf %1584 }
 0x62c   :  { %p1691_p7 = scmp.ne.s32.totalorder %s1585_s11, 0 }
 0x62e   :  { %1589 = shalt.err (%p1691_p7)  }
 0x62f   :  { %1591 = vsyncmov [#allocation3 + $0x1] }
 0x632   :  { %s1592_s13 = vpop.sfrf %1591 }
 0x633   :  { %p1692_p8 = scmp.ne.s32.totalorder %s1592_s13, 0 }
 0x635   :  { %1596 = shalt.err (%p1692_p8)  }
 0x636   :  { %1598 = vsyncmov [#allocation3 + $0x2] }
 0x639   :  { %s1599_s29 = vpop.sfrf %1598 }
 0x63a   :  { %p1693_p9 = scmp.ne.s32.totalorder %s1599_s29, 0 }
 0x63c   :  { %1603 = shalt.err (%p1693_p9)  }
 0x63d   :  { %1605 = vsyncmov [#allocation3 + $0x3] }
 0x640   :  { %s1606_s14 = vpop.sfrf %1605 }
 0x641   :  { %p1694_p10 = scmp.ne.s32.totalorder %s1606_s14, 0 }
 0x643   :  { %1610 = shalt.err (%p1694_p10)  }

</bundles_post_ra>
